<compile_context>
chip_gen: v6e
topology: v6e:2x2x1
jax: 0.10.0
libtpu: 0.0.40
codegen_flags: <defaults>
</compile_context>

<pallas_src>
import functools
import math

import jax
import jax.numpy as jnp
from jax import lax
from jax.experimental import pallas as pl
from jax.experimental.pallas import tpu as pltpu

# ----------------------------- tiny BERT config ------------------------------
B, S = 2, 8                  # batch, sequence length
H, NH, L, I = 32, 2, 2, 64   # hidden, heads, layers, intermediate
DH = H // NH                 # head dim
VOCAB, TYPES, MAXPOS = 100, 2, 16
EPS = 1e-12
INV_SQRT2 = 1.0 / math.sqrt(2.0)


# ------------------------------- fused kernel --------------------------------
def _layernorm(v, gamma, beta):
    mean = jnp.mean(v, axis=-1, keepdims=True)
    c = v - mean
    var = jnp.mean(c * c, axis=-1, keepdims=True)
    return c * lax.rsqrt(var + EPS) * gamma + beta


def bert_fused_kernel(x_ref, mask_ref, gvec_ref, wqkv_ref, wop_ref,
                      w1_ref, w2_ref, lvec_ref, logits_ref, *, num_heads):
    rows, Hd = x_ref.shape                 # rows = B*S
    Bn = logits_ref.shape[0]
    Sn = rows // Bn
    n_layers = wqkv_ref.shape[0]
    inter = w1_ref.shape[2]
    head_dim = Hd // num_heads

    emb_g = gvec_ref[0:1, :]
    emb_b = gvec_ref[1:2, :]
    mask = mask_ref[...]                   # (rows, rows) additive bias, f32

    # ---- embedding LayerNorm on fused (B*S, H) rows
    x = _layernorm(x_ref[...], emb_g, emb_b)

    for l in range(n_layers):              # unrolled encoder layers
        bqkv = lvec_ref[l, 0:1, :]         # (1, 3H)  (scale folded in)
        bo = lvec_ref[l, 1:2, :Hd]
        ln1g = lvec_ref[l, 2:3, :Hd]
        ln1b = lvec_ref[l, 3:4, :Hd]
        b1 = lvec_ref[l, 4:5, :inter]
        b2 = lvec_ref[l, 5:6, :Hd]
        ln2g = lvec_ref[l, 6:7, :Hd]
        ln2b = lvec_ref[l, 7:8, :Hd]

        # ---- fused QKV projection: one (B*S, H) @ (H, 3H) MXU matmul
        qkv = jnp.dot(x.astype(jnp.bfloat16), wqkv_ref[l],
                      preferred_element_type=jnp.float32) + bqkv
        qkv_bf = qkv.astype(jnp.bfloat16)

        # ---- attention on fused rows; block-diagonal mask keeps batches
        #      independent; softmax statistics stay in f32
        ctx_heads = []
        for h in range(num_heads):
            q = qkv_bf[:, h * head_dim:(h + 1) * head_dim]
            k = qkv_bf[:, Hd + h * head_dim:Hd + (h + 1) * head_dim]
            v = qkv_bf[:, 2 * Hd + h * head_dim:2 * Hd + (h + 1) * head_dim]
            s = lax.dot_general(q, k, (((1,), (1,)), ((), ())),
                                preferred_element_type=jnp.float32) + mask
            s = s - jnp.max(s, axis=-1, keepdims=True)
            p = jnp.exp(s)
            p = p * pl.reciprocal(jnp.sum(p, axis=-1, keepdims=True),
                                  approx=True)
            ctx_heads.append(jnp.dot(p.astype(jnp.bfloat16), v,
                                     preferred_element_type=jnp.float32))
        ctx = jnp.concatenate(ctx_heads, axis=-1)          # (B*S, H)

        # ---- single fused output projection + residual + LN
        attn = jnp.dot(ctx.astype(jnp.bfloat16), wop_ref[l],
                       preferred_element_type=jnp.float32) + bo
        x = _layernorm(attn + x, ln1g, ln1b)

        # ---- feed-forward on fused rows, exact erf GELU (HF BERT "gelu")
        hmid = jnp.dot(x.astype(jnp.bfloat16), w1_ref[l],
                       preferred_element_type=jnp.float32) + b1
        hmid = 0.5 * hmid * (1.0 + lax.erf(hmid * INV_SQRT2))
        ffn = jnp.dot(hmid.astype(jnp.bfloat16), w2_ref[l],
                      preferred_element_type=jnp.float32) + b2
        x = _layernorm(ffn + x, ln2g, ln2b)

    # ---- pooler tanh on [CLS] rows + classifier (num_labels=1), one store
    wp = wop_ref[n_layers]                                  # (H, H) bf16
    bp = gvec_ref[2:3, :]
    wcT = gvec_ref[3:4, :]
    bc = gvec_ref[4:5, 0:1]
    cls = jnp.concatenate([x[b * Sn:b * Sn + 1, :] for b in range(Bn)],
                          axis=0)                           # (B, H)
    pooled = jnp.tanh(jnp.dot(cls.astype(jnp.bfloat16), wp,
                              preferred_element_type=jnp.float32) + bp)
    logits_ref[...] = jnp.sum(pooled * wcT, axis=-1, keepdims=True) + bc


# ------------------------- deterministic parameter init ----------------------
def init_params(key):
    keys = iter(jax.random.split(key, 256))

    def w(shape):
        return jax.random.normal(next(keys), shape, jnp.float32) * 0.02

    params = {
        "word_emb": w((VOCAB, H)),
        "pos_emb": w((MAXPOS, H)),
        "type_emb": w((TYPES, H)),
        "emb_ln_g": jnp.ones((H,), jnp.float32),
        "emb_ln_b": jnp.zeros((H,), jnp.float32),
        "wp": w((H, H)),
        "bp": jnp.zeros((H,), jnp.float32),
        "wc": w((H, 1)),
        "bc": jnp.zeros((1,), jnp.float32),
        "layers": [],
    }
    for _ in range(L):
        params["layers"].append({
            "wq": w((H, H)), "bq": jnp.zeros((H,), jnp.float32),
            "wk": w((H, H)), "bk": jnp.zeros((H,), jnp.float32),
            "wv": w((H, H)), "bv": jnp.zeros((H,), jnp.float32),
            "wo": w((H, H)), "bo": jnp.zeros((H,), jnp.float32),
            "ln1_g": jnp.ones((H,), jnp.float32),
            "ln1_b": jnp.zeros((H,), jnp.float32),
            "w1": w((H, I)), "b1": jnp.zeros((I,), jnp.float32),
            "w2": w((I, H)), "b2": jnp.zeros((H,), jnp.float32),
            "ln2_g": jnp.ones((H,), jnp.float32),
            "ln2_b": jnp.zeros((H,), jnp.float32),
        })
    return params


def pack_params(params):
    """Fold 1/sqrt(DH) into wq/bq, fuse QKV, and pack everything into a few
    stacked arrays (weights bf16 for the MXU, bias/LN vectors f32)."""
    scale = 1.0 / math.sqrt(DH)
    W3 = 3 * H

    def pad_to(v, n):
        return jnp.pad(v, (0, n - v.shape[0]))

    wqkv, wop, w1, w2, lvec = [], [], [], [], []
    for lp in params["layers"]:
        wqkv.append(jnp.concatenate([lp["wq"] * scale, lp["wk"], lp["wv"]],
                                    axis=1))
        wop.append(lp["wo"])
        w1.append(lp["w1"])
        w2.append(lp["w2"])
        lvec.append(jnp.stack([
            jnp.concatenate([lp["bq"] * scale, lp["bk"], lp["bv"]]),
            pad_to(lp["bo"], W3), pad_to(lp["ln1_g"], W3),
            pad_to(lp["ln1_b"], W3), pad_to(lp["b1"], W3),
            pad_to(lp["b2"], W3), pad_to(lp["ln2_g"], W3),
            pad_to(lp["ln2_b"], W3),
        ], axis=0))
    wop.append(params["wp"])   # pooler dense shares the (H, H) stack

    gvec = jnp.stack([
        params["emb_ln_g"], params["emb_ln_b"], params["bp"],
        params["wc"][:, 0], pad_to(params["bc"], H),
    ], axis=0)

    return {
        "word_emb": params["word_emb"],
        "pos_emb": params["pos_emb"],
        "type_emb": params["type_emb"],
        "wqkv": jnp.stack(wqkv).astype(jnp.bfloat16),   # (L, H, 3H)
        "wop": jnp.stack(wop).astype(jnp.bfloat16),     # (L+1, H, H)
        "w1": jnp.stack(w1).astype(jnp.bfloat16),       # (L, H, I)
        "w2": jnp.stack(w2).astype(jnp.bfloat16),       # (L, I, H)
        "lvec": jnp.stack(lvec),                        # (L, 8, 3H) f32
        "gvec": gvec,                                   # (5, H)     f32
    }


# --------------------------------- forward -----------------------------------
def pretrained_model_forward(packed, input_ids, token_type_ids, attention_mask):
    Bn, Sn = input_ids.shape

    # Embedding-table gathers are plain-JAX glue (data-dependent row gather).
    # TODO(synk): fold the gather into the kernel via PrefetchScalarGridSpec +
    # pl.Element row-gather BlockSpecs when S grows; not worth it at (2, 8).
    emb = (packed["word_emb"][input_ids]
           + packed["pos_emb"][None, :Sn, :]
           + packed["type_emb"][token_type_ids]).astype(jnp.float32)
    x = emb.reshape(Bn * Sn, -1)                        # fused (B*S, H) rows

    # Block-diagonal additive mask over fused rows: query i may attend key j
    # iff same batch AND key j is a valid (unpadded) token.  Matches HF's
    # per-batch additive -1e9 mask exactly (cross-batch weights underflow to 0).
    att = attention_mask.astype(jnp.float32).reshape(-1)          # (B*S,)
    batch_ids = jnp.repeat(jnp.arange(Bn), Sn)
    allowed = (batch_ids[:, None] == batch_ids[None, :]) & (att[None, :] > 0)
    mask_bias = jnp.where(allowed, 0.0, -1e9).astype(jnp.float32)  # (B*S, B*S)

    vmem = pl.BlockSpec(memory_space=pltpu.MemorySpace.VMEM)
    inputs = (x, mask_bias, packed["gvec"], packed["wqkv"], packed["wop"],
              packed["w1"], packed["w2"], packed["lvec"])
    return pl.pallas_call(
        functools.partial(bert_fused_kernel, num_heads=NH),
        out_shape=jax.ShapeDtypeStruct((Bn, 1), jnp.float32),
        in_specs=[vmem] * len(inputs),
        out_specs=vmem,
    )(*inputs)


# ----------------------------------- main -------------------------------------
if __name__ == "__main__":
    key = jax.random.PRNGKey(0)
    pkey, ikey, tkey = jax.random.split(key, 3)

    packed = pack_params(init_params(pkey))

    input_ids = jax.random.randint(ikey, (B, S), 0, VOCAB, dtype=jnp.int32)
    token_type_ids = jax.random.randint(tkey, (B, S), 0, TYPES, dtype=jnp.int32)
    # batch 0 fully valid, batch 1 has last two tokens padded
    attention_mask = jnp.array(
        [[1] * S, [1] * (S - 2) + [0] * 2], dtype=jnp.int32)

    fwd = jax.jit(pretrained_model_forward)
    logits = fwd(packed, input_ids, token_type_ids, attention_mask)
    jax.block_until_ready(logits)
    assert logits.shape == (B, 1) and logits.dtype == jnp.float32
    print("KERNEL_OK")
</pallas_src>

<mosaic_0001>
module attributes {stable_mosaic.version = 11 : i64} {
  func.func @bert_fused_kernel(%arg0: memref<16x32xf32, #tpu.memory_space<vmem>>, %arg1: memref<16x16xf32, #tpu.memory_space<vmem>>, %arg2: memref<5x32xf32, #tpu.memory_space<vmem>>, %arg3: memref<2x32x96xbf16, #tpu.memory_space<vmem>>, %arg4: memref<3x32x32xbf16, #tpu.memory_space<vmem>>, %arg5: memref<2x32x64xbf16, #tpu.memory_space<vmem>>, %arg6: memref<2x64x32xbf16, #tpu.memory_space<vmem>>, %arg7: memref<2x8x96xf32, #tpu.memory_space<vmem>>, %arg8: memref<2x1xf32, #tpu.memory_space<vmem>>) attributes {dimension_semantics = [], scalar_prefetch = 0 : i64, scratch_operands = 0 : i64, tpu.core_type = #tpu.core_type<tc>} {
    %c0 = arith.constant 0 : index
    %c0_0 = arith.constant 0 : index
    %0 = vector.load %arg2[%c0, %c0_0] : memref<5x32xf32, #tpu.memory_space<vmem>>, vector<1x32xf32>
    %c1 = arith.constant 1 : index
    %c0_1 = arith.constant 0 : index
    %1 = vector.load %arg2[%c1, %c0_1] : memref<5x32xf32, #tpu.memory_space<vmem>>, vector<1x32xf32>
    %c0_2 = arith.constant 0 : index
    %c0_3 = arith.constant 0 : index
    %2 = vector.load %arg1[%c0_2, %c0_3] : memref<16x16xf32, #tpu.memory_space<vmem>>, vector<16x16xf32>
    %c0_4 = arith.constant 0 : index
    %c0_5 = arith.constant 0 : index
    %3 = vector.load %arg0[%c0_4, %c0_5] : memref<16x32xf32, #tpu.memory_space<vmem>>, vector<16x32xf32>
    %cst = arith.constant dense<0.000000e+00> : vector<16xf32>
    %4 = vector.multi_reduction <add>, %3, %cst [1] : vector<16x32xf32> to vector<16xf32>
    %5 = vector.shape_cast %4 : vector<16xf32> to vector<16x1xf32>
    %cst_6 = arith.constant 3.200000e+01 : f32
    %6 = vector.broadcast %cst_6 : f32 to vector<16x1xf32>
    %7 = arith.divf %5, %6 : vector<16x1xf32>
    %8 = vector.broadcast %7 : vector<16x1xf32> to vector<16x32xf32>
    %9 = arith.subf %3, %8 : vector<16x32xf32>
    %10 = arith.mulf %9, %9 : vector<16x32xf32>
    %cst_7 = arith.constant dense<0.000000e+00> : vector<16xf32>
    %11 = vector.multi_reduction <add>, %10, %cst_7 [1] : vector<16x32xf32> to vector<16xf32>
    %12 = vector.shape_cast %11 : vector<16xf32> to vector<16x1xf32>
    %cst_8 = arith.constant 3.200000e+01 : f32
    %13 = vector.broadcast %cst_8 : f32 to vector<16x1xf32>
    %14 = arith.divf %12, %13 : vector<16x1xf32>
    %cst_9 = arith.constant 9.99999996E-13 : f32
    %15 = vector.broadcast %cst_9 : f32 to vector<16x1xf32>
    %16 = arith.addf %14, %15 : vector<16x1xf32>
    %17 = math.rsqrt %16 : vector<16x1xf32>
    %18 = vector.broadcast %17 : vector<16x1xf32> to vector<16x32xf32>
    %19 = arith.mulf %9, %18 : vector<16x32xf32>
    %20 = vector.broadcast %0 : vector<1x32xf32> to vector<16x32xf32>
    %21 = arith.mulf %19, %20 : vector<16x32xf32>
    %22 = vector.broadcast %1 : vector<1x32xf32> to vector<16x32xf32>
    %23 = arith.addf %21, %22 : vector<16x32xf32>
    %c0_10 = arith.constant 0 : index
    %c0_11 = arith.constant 0 : index
    %c0_12 = arith.constant 0 : index
    %24 = vector.load %arg7[%c0_10, %c0_11, %c0_12] : memref<2x8x96xf32, #tpu.memory_space<vmem>>, vector<1x1x96xf32>
    %25 = vector.shape_cast %24 : vector<1x1x96xf32> to vector<1x96xf32>
    %c0_13 = arith.constant 0 : index
    %c1_14 = arith.constant 1 : index
    %c0_15 = arith.constant 0 : index
    %26 = vector.load %arg7[%c0_13, %c1_14, %c0_15] : memref<2x8x96xf32, #tpu.memory_space<vmem>>, vector<1x1x32xf32>
    %27 = vector.shape_cast %26 : vector<1x1x32xf32> to vector<1x32xf32>
    %c0_16 = arith.constant 0 : index
    %c2 = arith.constant 2 : index
    %c0_17 = arith.constant 0 : index
    %28 = vector.load %arg7[%c0_16, %c2, %c0_17] : memref<2x8x96xf32, #tpu.memory_space<vmem>>, vector<1x1x32xf32>
    %29 = vector.shape_cast %28 : vector<1x1x32xf32> to vector<1x32xf32>
    %c0_18 = arith.constant 0 : index
    %c3 = arith.constant 3 : index
    %c0_19 = arith.constant 0 : index
    %30 = vector.load %arg7[%c0_18, %c3, %c0_19] : memref<2x8x96xf32, #tpu.memory_space<vmem>>, vector<1x1x32xf32>
    %31 = vector.shape_cast %30 : vector<1x1x32xf32> to vector<1x32xf32>
    %c0_20 = arith.constant 0 : index
    %c4 = arith.constant 4 : index
    %c0_21 = arith.constant 0 : index
    %32 = vector.load %arg7[%c0_20, %c4, %c0_21] : memref<2x8x96xf32, #tpu.memory_space<vmem>>, vector<1x1x64xf32>
    %33 = vector.shape_cast %32 : vector<1x1x64xf32> to vector<1x64xf32>
    %c0_22 = arith.constant 0 : index
    %c5 = arith.constant 5 : index
    %c0_23 = arith.constant 0 : index
    %34 = vector.load %arg7[%c0_22, %c5, %c0_23] : memref<2x8x96xf32, #tpu.memory_space<vmem>>, vector<1x1x32xf32>
    %35 = vector.shape_cast %34 : vector<1x1x32xf32> to vector<1x32xf32>
    %c0_24 = arith.constant 0 : index
    %c6 = arith.constant 6 : index
    %c0_25 = arith.constant 0 : index
    %36 = vector.load %arg7[%c0_24, %c6, %c0_25] : memref<2x8x96xf32, #tpu.memory_space<vmem>>, vector<1x1x32xf32>
    %37 = vector.shape_cast %36 : vector<1x1x32xf32> to vector<1x32xf32>
    %c0_26 = arith.constant 0 : index
    %c7 = arith.constant 7 : index
    %c0_27 = arith.constant 0 : index
    %38 = vector.load %arg7[%c0_26, %c7, %c0_27] : memref<2x8x96xf32, #tpu.memory_space<vmem>>, vector<1x1x32xf32>
    %39 = vector.shape_cast %38 : vector<1x1x32xf32> to vector<1x32xf32>
    %40 = arith.truncf %23 : vector<16x32xf32> to vector<16x32xbf16>
    %c0_28 = arith.constant 0 : index
    %c0_29 = arith.constant 0 : index
    %c0_30 = arith.constant 0 : index
    %41 = vector.load %arg3[%c0_28, %c0_29, %c0_30] : memref<2x32x96xbf16, #tpu.memory_space<vmem>>, vector<1x32x96xbf16>
    %42 = vector.shape_cast %41 : vector<1x32x96xbf16> to vector<32x96xbf16>
    %cst_31 = arith.constant dense<0.000000e+00> : vector<16x96xf32>
    %43 = tpu.matmul %40, %42, %cst_31 {dimension_numbers = #tpu.dot_dimension_numbers<[1], [0], [0], [1], [0, 0, 1, 1], [], []>} : vector<16x32xbf16>, vector<32x96xbf16>, vector<16x96xf32> -> vector<16x96xf32>
    %44 = vector.broadcast %25 : vector<1x96xf32> to vector<16x96xf32>
    %45 = arith.addf %43, %44 : vector<16x96xf32>
    %46 = arith.truncf %45 : vector<16x96xf32> to vector<16x96xbf16>
    %47 = vector.extract_strided_slice %46 {offsets = [0, 0], sizes = [16, 16], strides = [1, 1]} : vector<16x96xbf16> to vector<16x16xbf16>
    %48 = vector.extract_strided_slice %46 {offsets = [0, 32], sizes = [16, 16], strides = [1, 1]} : vector<16x96xbf16> to vector<16x16xbf16>
    %49 = vector.extract_strided_slice %46 {offsets = [0, 64], sizes = [16, 16], strides = [1, 1]} : vector<16x96xbf16> to vector<16x16xbf16>
    %cst_32 = arith.constant dense<0.000000e+00> : vector<16x16xf32>
    %50 = tpu.matmul %47, %48, %cst_32 {dimension_numbers = #tpu.dot_dimension_numbers<[1], [1], [0], [0], [0, 0, 1, 0], [], []>} : vector<16x16xbf16>, vector<16x16xbf16>, vector<16x16xf32> -> vector<16x16xf32>
    %51 = arith.addf %50, %2 : vector<16x16xf32>
    %cst_33 = arith.constant dense<0xFF800000> : vector<16xf32>
    %52 = vector.multi_reduction <maximumf>, %51, %cst_33 [1] : vector<16x16xf32> to vector<16xf32>
    %53 = vector.shape_cast %52 : vector<16xf32> to vector<16x1xf32>
    %54 = vector.broadcast %53 : vector<16x1xf32> to vector<16x16xf32>
    %55 = arith.subf %51, %54 : vector<16x16xf32>
    %56 = math.exp %55 : vector<16x16xf32>
    %cst_34 = arith.constant dense<0.000000e+00> : vector<16xf32>
    %57 = vector.multi_reduction <add>, %56, %cst_34 [1] : vector<16x16xf32> to vector<16xf32>
    %58 = vector.shape_cast %57 : vector<16xf32> to vector<16x1xf32>
    %59 = tpu.reciprocal %58 {approx = true} : vector<16x1xf32> -> vector<16x1xf32>
    %60 = vector.broadcast %59 : vector<16x1xf32> to vector<16x16xf32>
    %61 = arith.mulf %56, %60 : vector<16x16xf32>
    %62 = arith.truncf %61 : vector<16x16xf32> to vector<16x16xbf16>
    %cst_35 = arith.constant dense<0.000000e+00> : vector<16x16xf32>
    %63 = tpu.matmul %62, %49, %cst_35 {dimension_numbers = #tpu.dot_dimension_numbers<[1], [0], [0], [1], [0, 0, 1, 1], [], []>} : vector<16x16xbf16>, vector<16x16xbf16>, vector<16x16xf32> -> vector<16x16xf32>
    %64 = vector.extract_strided_slice %46 {offsets = [0, 16], sizes = [16, 16], strides = [1, 1]} : vector<16x96xbf16> to vector<16x16xbf16>
    %65 = vector.extract_strided_slice %46 {offsets = [0, 48], sizes = [16, 16], strides = [1, 1]} : vector<16x96xbf16> to vector<16x16xbf16>
    %66 = vector.extract_strided_slice %46 {offsets = [0, 80], sizes = [16, 16], strides = [1, 1]} : vector<16x96xbf16> to vector<16x16xbf16>
    %cst_36 = arith.constant dense<0.000000e+00> : vector<16x16xf32>
    %67 = tpu.matmul %64, %65, %cst_36 {dimension_numbers = #tpu.dot_dimension_numbers<[1], [1], [0], [0], [0, 0, 1, 0], [], []>} : vector<16x16xbf16>, vector<16x16xbf16>, vector<16x16xf32> -> vector<16x16xf32>
    %68 = arith.addf %67, %2 : vector<16x16xf32>
    %cst_37 = arith.constant dense<0xFF800000> : vector<16xf32>
    %69 = vector.multi_reduction <maximumf>, %68, %cst_37 [1] : vector<16x16xf32> to vector<16xf32>
    %70 = vector.shape_cast %69 : vector<16xf32> to vector<16x1xf32>
    %71 = vector.broadcast %70 : vector<16x1xf32> to vector<16x16xf32>
    %72 = arith.subf %68, %71 : vector<16x16xf32>
    %73 = math.exp %72 : vector<16x16xf32>
    %cst_38 = arith.constant dense<0.000000e+00> : vector<16xf32>
    %74 = vector.multi_reduction <add>, %73, %cst_38 [1] : vector<16x16xf32> to vector<16xf32>
    %75 = vector.shape_cast %74 : vector<16xf32> to vector<16x1xf32>
    %76 = tpu.reciprocal %75 {approx = true} : vector<16x1xf32> -> vector<16x1xf32>
    %77 = vector.broadcast %76 : vector<16x1xf32> to vector<16x16xf32>
    %78 = arith.mulf %73, %77 : vector<16x16xf32>
    %79 = arith.truncf %78 : vector<16x16xf32> to vector<16x16xbf16>
    %cst_39 = arith.constant dense<0.000000e+00> : vector<16x16xf32>
    %80 = tpu.matmul %79, %66, %cst_39 {dimension_numbers = #tpu.dot_dimension_numbers<[1], [0], [0], [1], [0, 0, 1, 1], [], []>} : vector<16x16xbf16>, vector<16x16xbf16>, vector<16x16xf32> -> vector<16x16xf32>
    %81 = tpu.concatenate %63, %80 in 1 : vector<16x16xf32>, vector<16x16xf32> -> vector<16x32xf32>
    %82 = arith.truncf %81 : vector<16x32xf32> to vector<16x32xbf16>
    %c0_40 = arith.constant 0 : index
    %c0_41 = arith.constant 0 : index
    %c0_42 = arith.constant 0 : index
    %83 = vector.load %arg4[%c0_40, %c0_41, %c0_42] : memref<3x32x32xbf16, #tpu.memory_space<vmem>>, vector<1x32x32xbf16>
    %84 = vector.shape_cast %83 : vector<1x32x32xbf16> to vector<32x32xbf16>
    %cst_43 = arith.constant dense<0.000000e+00> : vector<16x32xf32>
    %85 = tpu.matmul %82, %84, %cst_43 {dimension_numbers = #tpu.dot_dimension_numbers<[1], [0], [0], [1], [0, 0, 1, 1], [], []>} : vector<16x32xbf16>, vector<32x32xbf16>, vector<16x32xf32> -> vector<16x32xf32>
    %86 = vector.broadcast %27 : vector<1x32xf32> to vector<16x32xf32>
    %87 = arith.addf %85, %86 : vector<16x32xf32>
    %88 = arith.addf %87, %23 : vector<16x32xf32>
    %cst_44 = arith.constant dense<0.000000e+00> : vector<16xf32>
    %89 = vector.multi_reduction <add>, %88, %cst_44 [1] : vector<16x32xf32> to vector<16xf32>
    %90 = vector.shape_cast %89 : vector<16xf32> to vector<16x1xf32>
    %cst_45 = arith.constant 3.200000e+01 : f32
    %91 = vector.broadcast %cst_45 : f32 to vector<16x1xf32>
    %92 = arith.divf %90, %91 : vector<16x1xf32>
    %93 = vector.broadcast %92 : vector<16x1xf32> to vector<16x32xf32>
    %94 = arith.subf %88, %93 : vector<16x32xf32>
    %95 = arith.mulf %94, %94 : vector<16x32xf32>
    %cst_46 = arith.constant dense<0.000000e+00> : vector<16xf32>
    %96 = vector.multi_reduction <add>, %95, %cst_46 [1] : vector<16x32xf32> to vector<16xf32>
    %97 = vector.shape_cast %96 : vector<16xf32> to vector<16x1xf32>
    %cst_47 = arith.constant 3.200000e+01 : f32
    %98 = vector.broadcast %cst_47 : f32 to vector<16x1xf32>
    %99 = arith.divf %97, %98 : vector<16x1xf32>
    %cst_48 = arith.constant 9.99999996E-13 : f32
    %100 = vector.broadcast %cst_48 : f32 to vector<16x1xf32>
    %101 = arith.addf %99, %100 : vector<16x1xf32>
    %102 = math.rsqrt %101 : vector<16x1xf32>
    %103 = vector.broadcast %102 : vector<16x1xf32> to vector<16x32xf32>
    %104 = arith.mulf %94, %103 : vector<16x32xf32>
    %105 = vector.broadcast %29 : vector<1x32xf32> to vector<16x32xf32>
    %106 = arith.mulf %104, %105 : vector<16x32xf32>
    %107 = vector.broadcast %31 : vector<1x32xf32> to vector<16x32xf32>
    %108 = arith.addf %106, %107 : vector<16x32xf32>
    %109 = arith.truncf %108 : vector<16x32xf32> to vector<16x32xbf16>
    %c0_49 = arith.constant 0 : index
    %c0_50 = arith.constant 0 : index
    %c0_51 = arith.constant 0 : index
    %110 = vector.load %arg5[%c0_49, %c0_50, %c0_51] : memref<2x32x64xbf16, #tpu.memory_space<vmem>>, vector<1x32x64xbf16>
    %111 = vector.shape_cast %110 : vector<1x32x64xbf16> to vector<32x64xbf16>
    %cst_52 = arith.constant dense<0.000000e+00> : vector<16x64xf32>
    %112 = tpu.matmul %109, %111, %cst_52 {dimension_numbers = #tpu.dot_dimension_numbers<[1], [0], [0], [1], [0, 0, 1, 1], [], []>} : vector<16x32xbf16>, vector<32x64xbf16>, vector<16x64xf32> -> vector<16x64xf32>
    %113 = vector.broadcast %33 : vector<1x64xf32> to vector<16x64xf32>
    %114 = arith.addf %112, %113 : vector<16x64xf32>
    %cst_53 = arith.constant 5.000000e-01 : f32
    %115 = vector.broadcast %cst_53 : f32 to vector<16x64xf32>
    %116 = arith.mulf %115, %114 : vector<16x64xf32>
    %cst_54 = arith.constant 0.707106769 : f32
    %117 = vector.broadcast %cst_54 : f32 to vector<16x64xf32>
    %118 = arith.mulf %114, %117 : vector<16x64xf32>
    %119 = math.erf %118 : vector<16x64xf32>
    %cst_55 = arith.constant 1.000000e+00 : f32
    %120 = vector.broadcast %cst_55 : f32 to vector<16x64xf32>
    %121 = arith.addf %120, %119 : vector<16x64xf32>
    %122 = arith.mulf %116, %121 : vector<16x64xf32>
    %123 = arith.truncf %122 : vector<16x64xf32> to vector<16x64xbf16>
    %c0_56 = arith.constant 0 : index
    %c0_57 = arith.constant 0 : index
    %c0_58 = arith.constant 0 : index
    %124 = vector.load %arg6[%c0_56, %c0_57, %c0_58] : memref<2x64x32xbf16, #tpu.memory_space<vmem>>, vector<1x64x32xbf16>
    %125 = vector.shape_cast %124 : vector<1x64x32xbf16> to vector<64x32xbf16>
    %cst_59 = arith.constant dense<0.000000e+00> : vector<16x32xf32>
    %126 = tpu.matmul %123, %125, %cst_59 {dimension_numbers = #tpu.dot_dimension_numbers<[1], [0], [0], [1], [0, 0, 1, 1], [], []>} : vector<16x64xbf16>, vector<64x32xbf16>, vector<16x32xf32> -> vector<16x32xf32>
    %127 = vector.broadcast %35 : vector<1x32xf32> to vector<16x32xf32>
    %128 = arith.addf %126, %127 : vector<16x32xf32>
    %129 = arith.addf %128, %108 : vector<16x32xf32>
    %cst_60 = arith.constant dense<0.000000e+00> : vector<16xf32>
    %130 = vector.multi_reduction <add>, %129, %cst_60 [1] : vector<16x32xf32> to vector<16xf32>
    %131 = vector.shape_cast %130 : vector<16xf32> to vector<16x1xf32>
    %cst_61 = arith.constant 3.200000e+01 : f32
    %132 = vector.broadcast %cst_61 : f32 to vector<16x1xf32>
    %133 = arith.divf %131, %132 : vector<16x1xf32>
    %134 = vector.broadcast %133 : vector<16x1xf32> to vector<16x32xf32>
    %135 = arith.subf %129, %134 : vector<16x32xf32>
    %136 = arith.mulf %135, %135 : vector<16x32xf32>
    %cst_62 = arith.constant dense<0.000000e+00> : vector<16xf32>
    %137 = vector.multi_reduction <add>, %136, %cst_62 [1] : vector<16x32xf32> to vector<16xf32>
    %138 = vector.shape_cast %137 : vector<16xf32> to vector<16x1xf32>
    %cst_63 = arith.constant 3.200000e+01 : f32
    %139 = vector.broadcast %cst_63 : f32 to vector<16x1xf32>
    %140 = arith.divf %138, %139 : vector<16x1xf32>
    %cst_64 = arith.constant 9.99999996E-13 : f32
    %141 = vector.broadcast %cst_64 : f32 to vector<16x1xf32>
    %142 = arith.addf %140, %141 : vector<16x1xf32>
    %143 = math.rsqrt %142 : vector<16x1xf32>
    %144 = vector.broadcast %143 : vector<16x1xf32> to vector<16x32xf32>
    %145 = arith.mulf %135, %144 : vector<16x32xf32>
    %146 = vector.broadcast %37 : vector<1x32xf32> to vector<16x32xf32>
    %147 = arith.mulf %145, %146 : vector<16x32xf32>
    %148 = vector.broadcast %39 : vector<1x32xf32> to vector<16x32xf32>
    %149 = arith.addf %147, %148 : vector<16x32xf32>
    %c1_65 = arith.constant 1 : index
    %c0_66 = arith.constant 0 : index
    %c0_67 = arith.constant 0 : index
    %150 = vector.load %arg7[%c1_65, %c0_66, %c0_67] : memref<2x8x96xf32, #tpu.memory_space<vmem>>, vector<1x1x96xf32>
    %151 = vector.shape_cast %150 : vector<1x1x96xf32> to vector<1x96xf32>
    %c1_68 = arith.constant 1 : index
    %c1_69 = arith.constant 1 : index
    %c0_70 = arith.constant 0 : index
    %152 = vector.load %arg7[%c1_68, %c1_69, %c0_70] : memref<2x8x96xf32, #tpu.memory_space<vmem>>, vector<1x1x32xf32>
    %153 = vector.shape_cast %152 : vector<1x1x32xf32> to vector<1x32xf32>
    %c1_71 = arith.constant 1 : index
    %c2_72 = arith.constant 2 : index
    %c0_73 = arith.constant 0 : index
    %154 = vector.load %arg7[%c1_71, %c2_72, %c0_73] : memref<2x8x96xf32, #tpu.memory_space<vmem>>, vector<1x1x32xf32>
    %155 = vector.shape_cast %154 : vector<1x1x32xf32> to vector<1x32xf32>
    %c1_74 = arith.constant 1 : index
    %c3_75 = arith.constant 3 : index
    %c0_76 = arith.constant 0 : index
    %156 = vector.load %arg7[%c1_74, %c3_75, %c0_76] : memref<2x8x96xf32, #tpu.memory_space<vmem>>, vector<1x1x32xf32>
    %157 = vector.shape_cast %156 : vector<1x1x32xf32> to vector<1x32xf32>
    %c1_77 = arith.constant 1 : index
    %c4_78 = arith.constant 4 : index
    %c0_79 = arith.constant 0 : index
    %158 = vector.load %arg7[%c1_77, %c4_78, %c0_79] : memref<2x8x96xf32, #tpu.memory_space<vmem>>, vector<1x1x64xf32>
    %159 = vector.shape_cast %158 : vector<1x1x64xf32> to vector<1x64xf32>
    %c1_80 = arith.constant 1 : index
    %c5_81 = arith.constant 5 : index
    %c0_82 = arith.constant 0 : index
    %160 = vector.load %arg7[%c1_80, %c5_81, %c0_82] : memref<2x8x96xf32, #tpu.memory_space<vmem>>, vector<1x1x32xf32>
    %161 = vector.shape_cast %160 : vector<1x1x32xf32> to vector<1x32xf32>
    %c1_83 = arith.constant 1 : index
    %c6_84 = arith.constant 6 : index
    %c0_85 = arith.constant 0 : index
    %162 = vector.load %arg7[%c1_83, %c6_84, %c0_85] : memref<2x8x96xf32, #tpu.memory_space<vmem>>, vector<1x1x32xf32>
    %163 = vector.shape_cast %162 : vector<1x1x32xf32> to vector<1x32xf32>
    %c1_86 = arith.constant 1 : index
    %c7_87 = arith.constant 7 : index
    %c0_88 = arith.constant 0 : index
    %164 = vector.load %arg7[%c1_86, %c7_87, %c0_88] : memref<2x8x96xf32, #tpu.memory_space<vmem>>, vector<1x1x32xf32>
    %165 = vector.shape_cast %164 : vector<1x1x32xf32> to vector<1x32xf32>
    %166 = arith.truncf %149 : vector<16x32xf32> to vector<16x32xbf16>
    %c1_89 = arith.constant 1 : index
    %c0_90 = arith.constant 0 : index
    %c0_91 = arith.constant 0 : index
    %167 = vector.load %arg3[%c1_89, %c0_90, %c0_91] : memref<2x32x96xbf16, #tpu.memory_space<vmem>>, vector<1x32x96xbf16>
    %168 = vector.shape_cast %167 : vector<1x32x96xbf16> to vector<32x96xbf16>
    %cst_92 = arith.constant dense<0.000000e+00> : vector<16x96xf32>
    %169 = tpu.matmul %166, %168, %cst_92 {dimension_numbers = #tpu.dot_dimension_numbers<[1], [0], [0], [1], [0, 0, 1, 1], [], []>} : vector<16x32xbf16>, vector<32x96xbf16>, vector<16x96xf32> -> vector<16x96xf32>
    %170 = vector.broadcast %151 : vector<1x96xf32> to vector<16x96xf32>
    %171 = arith.addf %169, %170 : vector<16x96xf32>
    %172 = arith.truncf %171 : vector<16x96xf32> to vector<16x96xbf16>
    %173 = vector.extract_strided_slice %172 {offsets = [0, 0], sizes = [16, 16], strides = [1, 1]} : vector<16x96xbf16> to vector<16x16xbf16>
    %174 = vector.extract_strided_slice %172 {offsets = [0, 32], sizes = [16, 16], strides = [1, 1]} : vector<16x96xbf16> to vector<16x16xbf16>
    %175 = vector.extract_strided_slice %172 {offsets = [0, 64], sizes = [16, 16], strides = [1, 1]} : vector<16x96xbf16> to vector<16x16xbf16>
    %cst_93 = arith.constant dense<0.000000e+00> : vector<16x16xf32>
    %176 = tpu.matmul %173, %174, %cst_93 {dimension_numbers = #tpu.dot_dimension_numbers<[1], [1], [0], [0], [0, 0, 1, 0], [], []>} : vector<16x16xbf16>, vector<16x16xbf16>, vector<16x16xf32> -> vector<16x16xf32>
    %177 = arith.addf %176, %2 : vector<16x16xf32>
    %cst_94 = arith.constant dense<0xFF800000> : vector<16xf32>
    %178 = vector.multi_reduction <maximumf>, %177, %cst_94 [1] : vector<16x16xf32> to vector<16xf32>
    %179 = vector.shape_cast %178 : vector<16xf32> to vector<16x1xf32>
    %180 = vector.broadcast %179 : vector<16x1xf32> to vector<16x16xf32>
    %181 = arith.subf %177, %180 : vector<16x16xf32>
    %182 = math.exp %181 : vector<16x16xf32>
    %cst_95 = arith.constant dense<0.000000e+00> : vector<16xf32>
    %183 = vector.multi_reduction <add>, %182, %cst_95 [1] : vector<16x16xf32> to vector<16xf32>
    %184 = vector.shape_cast %183 : vector<16xf32> to vector<16x1xf32>
    %185 = tpu.reciprocal %184 {approx = true} : vector<16x1xf32> -> vector<16x1xf32>
    %186 = vector.broadcast %185 : vector<16x1xf32> to vector<16x16xf32>
    %187 = arith.mulf %182, %186 : vector<16x16xf32>
    %188 = arith.truncf %187 : vector<16x16xf32> to vector<16x16xbf16>
    %cst_96 = arith.constant dense<0.000000e+00> : vector<16x16xf32>
    %189 = tpu.matmul %188, %175, %cst_96 {dimension_numbers = #tpu.dot_dimension_numbers<[1], [0], [0], [1], [0, 0, 1, 1], [], []>} : vector<16x16xbf16>, vector<16x16xbf16>, vector<16x16xf32> -> vector<16x16xf32>
    %190 = vector.extract_strided_slice %172 {offsets = [0, 16], sizes = [16, 16], strides = [1, 1]} : vector<16x96xbf16> to vector<16x16xbf16>
    %191 = vector.extract_strided_slice %172 {offsets = [0, 48], sizes = [16, 16], strides = [1, 1]} : vector<16x96xbf16> to vector<16x16xbf16>
    %192 = vector.extract_strided_slice %172 {offsets = [0, 80], sizes = [16, 16], strides = [1, 1]} : vector<16x96xbf16> to vector<16x16xbf16>
    %cst_97 = arith.constant dense<0.000000e+00> : vector<16x16xf32>
    %193 = tpu.matmul %190, %191, %cst_97 {dimension_numbers = #tpu.dot_dimension_numbers<[1], [1], [0], [0], [0, 0, 1, 0], [], []>} : vector<16x16xbf16>, vector<16x16xbf16>, vector<16x16xf32> -> vector<16x16xf32>
    %194 = arith.addf %193, %2 : vector<16x16xf32>
    %cst_98 = arith.constant dense<0xFF800000> : vector<16xf32>
    %195 = vector.multi_reduction <maximumf>, %194, %cst_98 [1] : vector<16x16xf32> to vector<16xf32>
    %196 = vector.shape_cast %195 : vector<16xf32> to vector<16x1xf32>
    %197 = vector.broadcast %196 : vector<16x1xf32> to vector<16x16xf32>
    %198 = arith.subf %194, %197 : vector<16x16xf32>
    %199 = math.exp %198 : vector<16x16xf32>
    %cst_99 = arith.constant dense<0.000000e+00> : vector<16xf32>
    %200 = vector.multi_reduction <add>, %199, %cst_99 [1] : vector<16x16xf32> to vector<16xf32>
    %201 = vector.shape_cast %200 : vector<16xf32> to vector<16x1xf32>
    %202 = tpu.reciprocal %201 {approx = true} : vector<16x1xf32> -> vector<16x1xf32>
    %203 = vector.broadcast %202 : vector<16x1xf32> to vector<16x16xf32>
    %204 = arith.mulf %199, %203 : vector<16x16xf32>
    %205 = arith.truncf %204 : vector<16x16xf32> to vector<16x16xbf16>
    %cst_100 = arith.constant dense<0.000000e+00> : vector<16x16xf32>
    %206 = tpu.matmul %205, %192, %cst_100 {dimension_numbers = #tpu.dot_dimension_numbers<[1], [0], [0], [1], [0, 0, 1, 1], [], []>} : vector<16x16xbf16>, vector<16x16xbf16>, vector<16x16xf32> -> vector<16x16xf32>
    %207 = tpu.concatenate %189, %206 in 1 : vector<16x16xf32>, vector<16x16xf32> -> vector<16x32xf32>
    %208 = arith.truncf %207 : vector<16x32xf32> to vector<16x32xbf16>
    %c1_101 = arith.constant 1 : index
    %c0_102 = arith.constant 0 : index
    %c0_103 = arith.constant 0 : index
    %209 = vector.load %arg4[%c1_101, %c0_102, %c0_103] : memref<3x32x32xbf16, #tpu.memory_space<vmem>>, vector<1x32x32xbf16>
    %210 = vector.shape_cast %209 : vector<1x32x32xbf16> to vector<32x32xbf16>
    %cst_104 = arith.constant dense<0.000000e+00> : vector<16x32xf32>
    %211 = tpu.matmul %208, %210, %cst_104 {dimension_numbers = #tpu.dot_dimension_numbers<[1], [0], [0], [1], [0, 0, 1, 1], [], []>} : vector<16x32xbf16>, vector<32x32xbf16>, vector<16x32xf32> -> vector<16x32xf32>
    %212 = vector.broadcast %153 : vector<1x32xf32> to vector<16x32xf32>
    %213 = arith.addf %211, %212 : vector<16x32xf32>
    %214 = arith.addf %213, %149 : vector<16x32xf32>
    %cst_105 = arith.constant dense<0.000000e+00> : vector<16xf32>
    %215 = vector.multi_reduction <add>, %214, %cst_105 [1] : vector<16x32xf32> to vector<16xf32>
    %216 = vector.shape_cast %215 : vector<16xf32> to vector<16x1xf32>
    %cst_106 = arith.constant 3.200000e+01 : f32
    %217 = vector.broadcast %cst_106 : f32 to vector<16x1xf32>
    %218 = arith.divf %216, %217 : vector<16x1xf32>
    %219 = vector.broadcast %218 : vector<16x1xf32> to vector<16x32xf32>
    %220 = arith.subf %214, %219 : vector<16x32xf32>
    %221 = arith.mulf %220, %220 : vector<16x32xf32>
    %cst_107 = arith.constant dense<0.000000e+00> : vector<16xf32>
    %222 = vector.multi_reduction <add>, %221, %cst_107 [1] : vector<16x32xf32> to vector<16xf32>
    %223 = vector.shape_cast %222 : vector<16xf32> to vector<16x1xf32>
    %cst_108 = arith.constant 3.200000e+01 : f32
    %224 = vector.broadcast %cst_108 : f32 to vector<16x1xf32>
    %225 = arith.divf %223, %224 : vector<16x1xf32>
    %cst_109 = arith.constant 9.99999996E-13 : f32
    %226 = vector.broadcast %cst_109 : f32 to vector<16x1xf32>
    %227 = arith.addf %225, %226 : vector<16x1xf32>
    %228 = math.rsqrt %227 : vector<16x1xf32>
    %229 = vector.broadcast %228 : vector<16x1xf32> to vector<16x32xf32>
    %230 = arith.mulf %220, %229 : vector<16x32xf32>
    %231 = vector.broadcast %155 : vector<1x32xf32> to vector<16x32xf32>
    %232 = arith.mulf %230, %231 : vector<16x32xf32>
    %233 = vector.broadcast %157 : vector<1x32xf32> to vector<16x32xf32>
    %234 = arith.addf %232, %233 : vector<16x32xf32>
    %235 = arith.truncf %234 : vector<16x32xf32> to vector<16x32xbf16>
    %c1_110 = arith.constant 1 : index
    %c0_111 = arith.constant 0 : index
    %c0_112 = arith.constant 0 : index
    %236 = vector.load %arg5[%c1_110, %c0_111, %c0_112] : memref<2x32x64xbf16, #tpu.memory_space<vmem>>, vector<1x32x64xbf16>
    %237 = vector.shape_cast %236 : vector<1x32x64xbf16> to vector<32x64xbf16>
    %cst_113 = arith.constant dense<0.000000e+00> : vector<16x64xf32>
    %238 = tpu.matmul %235, %237, %cst_113 {dimension_numbers = #tpu.dot_dimension_numbers<[1], [0], [0], [1], [0, 0, 1, 1], [], []>} : vector<16x32xbf16>, vector<32x64xbf16>, vector<16x64xf32> -> vector<16x64xf32>
    %239 = vector.broadcast %159 : vector<1x64xf32> to vector<16x64xf32>
    %240 = arith.addf %238, %239 : vector<16x64xf32>
    %cst_114 = arith.constant 5.000000e-01 : f32
    %241 = vector.broadcast %cst_114 : f32 to vector<16x64xf32>
    %242 = arith.mulf %241, %240 : vector<16x64xf32>
    %cst_115 = arith.constant 0.707106769 : f32
    %243 = vector.broadcast %cst_115 : f32 to vector<16x64xf32>
    %244 = arith.mulf %240, %243 : vector<16x64xf32>
    %245 = math.erf %244 : vector<16x64xf32>
    %cst_116 = arith.constant 1.000000e+00 : f32
    %246 = vector.broadcast %cst_116 : f32 to vector<16x64xf32>
    %247 = arith.addf %246, %245 : vector<16x64xf32>
    %248 = arith.mulf %242, %247 : vector<16x64xf32>
    %249 = arith.truncf %248 : vector<16x64xf32> to vector<16x64xbf16>
    %c1_117 = arith.constant 1 : index
    %c0_118 = arith.constant 0 : index
    %c0_119 = arith.constant 0 : index
    %250 = vector.load %arg6[%c1_117, %c0_118, %c0_119] : memref<2x64x32xbf16, #tpu.memory_space<vmem>>, vector<1x64x32xbf16>
    %251 = vector.shape_cast %250 : vector<1x64x32xbf16> to vector<64x32xbf16>
    %cst_120 = arith.constant dense<0.000000e+00> : vector<16x32xf32>
    %252 = tpu.matmul %249, %251, %cst_120 {dimension_numbers = #tpu.dot_dimension_numbers<[1], [0], [0], [1], [0, 0, 1, 1], [], []>} : vector<16x64xbf16>, vector<64x32xbf16>, vector<16x32xf32> -> vector<16x32xf32>
    %253 = vector.broadcast %161 : vector<1x32xf32> to vector<16x32xf32>
    %254 = arith.addf %252, %253 : vector<16x32xf32>
    %255 = arith.addf %254, %234 : vector<16x32xf32>
    %cst_121 = arith.constant dense<0.000000e+00> : vector<16xf32>
    %256 = vector.multi_reduction <add>, %255, %cst_121 [1] : vector<16x32xf32> to vector<16xf32>
    %257 = vector.shape_cast %256 : vector<16xf32> to vector<16x1xf32>
    %cst_122 = arith.constant 3.200000e+01 : f32
    %258 = vector.broadcast %cst_122 : f32 to vector<16x1xf32>
    %259 = arith.divf %257, %258 : vector<16x1xf32>
    %260 = vector.broadcast %259 : vector<16x1xf32> to vector<16x32xf32>
    %261 = arith.subf %255, %260 : vector<16x32xf32>
    %262 = arith.mulf %261, %261 : vector<16x32xf32>
    %cst_123 = arith.constant dense<0.000000e+00> : vector<16xf32>
    %263 = vector.multi_reduction <add>, %262, %cst_123 [1] : vector<16x32xf32> to vector<16xf32>
    %264 = vector.shape_cast %263 : vector<16xf32> to vector<16x1xf32>
    %cst_124 = arith.constant 3.200000e+01 : f32
    %265 = vector.broadcast %cst_124 : f32 to vector<16x1xf32>
    %266 = arith.divf %264, %265 : vector<16x1xf32>
    %cst_125 = arith.constant 9.99999996E-13 : f32
    %267 = vector.broadcast %cst_125 : f32 to vector<16x1xf32>
    %268 = arith.addf %266, %267 : vector<16x1xf32>
    %269 = math.rsqrt %268 : vector<16x1xf32>
    %270 = vector.broadcast %269 : vector<16x1xf32> to vector<16x32xf32>
    %271 = arith.mulf %261, %270 : vector<16x32xf32>
    %272 = vector.broadcast %163 : vector<1x32xf32> to vector<16x32xf32>
    %273 = arith.mulf %271, %272 : vector<16x32xf32>
    %274 = vector.broadcast %165 : vector<1x32xf32> to vector<16x32xf32>
    %275 = arith.addf %273, %274 : vector<16x32xf32>
    %c2_126 = arith.constant 2 : index
    %c0_127 = arith.constant 0 : index
    %c0_128 = arith.constant 0 : index
    %276 = vector.load %arg4[%c2_126, %c0_127, %c0_128] : memref<3x32x32xbf16, #tpu.memory_space<vmem>>, vector<1x32x32xbf16>
    %277 = vector.shape_cast %276 : vector<1x32x32xbf16> to vector<32x32xbf16>
    %c2_129 = arith.constant 2 : index
    %c0_130 = arith.constant 0 : index
    %278 = vector.load %arg2[%c2_129, %c0_130] : memref<5x32xf32, #tpu.memory_space<vmem>>, vector<1x32xf32>
    %c3_131 = arith.constant 3 : index
    %c0_132 = arith.constant 0 : index
    %279 = vector.load %arg2[%c3_131, %c0_132] : memref<5x32xf32, #tpu.memory_space<vmem>>, vector<1x32xf32>
    %c4_133 = arith.constant 4 : index
    %c0_134 = arith.constant 0 : index
    %280 = vector.load %arg2[%c4_133, %c0_134] : memref<5x32xf32, #tpu.memory_space<vmem>>, vector<1x1xf32>
    %281 = vector.extract_strided_slice %275 {offsets = [0, 0], sizes = [1, 32], strides = [1, 1]} : vector<16x32xf32> to vector<1x32xf32>
    %282 = vector.extract_strided_slice %275 {offsets = [8, 0], sizes = [1, 32], strides = [1, 1]} : vector<16x32xf32> to vector<1x32xf32>
    %283 = tpu.concatenate %281, %282 in 0 : vector<1x32xf32>, vector<1x32xf32> -> vector<2x32xf32>
    %284 = arith.truncf %283 : vector<2x32xf32> to vector<2x32xbf16>
    %cst_135 = arith.constant dense<0.000000e+00> : vector<2x32xf32>
    %285 = tpu.matmul %284, %277, %cst_135 {dimension_numbers = #tpu.dot_dimension_numbers<[1], [0], [0], [1], [0, 0, 1, 1], [], []>} : vector<2x32xbf16>, vector<32x32xbf16>, vector<2x32xf32> -> vector<2x32xf32>
    %286 = vector.broadcast %278 : vector<1x32xf32> to vector<2x32xf32>
    %287 = arith.addf %285, %286 : vector<2x32xf32>
    %288 = math.tanh %287 : vector<2x32xf32>
    %289 = vector.broadcast %279 : vector<1x32xf32> to vector<2x32xf32>
    %290 = arith.mulf %288, %289 : vector<2x32xf32>
    %cst_136 = arith.constant dense<0.000000e+00> : vector<2xf32>
    %291 = vector.multi_reduction <add>, %290, %cst_136 [1] : vector<2x32xf32> to vector<2xf32>
    %292 = vector.shape_cast %291 : vector<2xf32> to vector<2x1xf32>
    %293 = vector.broadcast %280 : vector<1x1xf32> to vector<2x1xf32>
    %294 = arith.addf %292, %293 : vector<2x1xf32>
    %c0_137 = arith.constant 0 : index
    %c0_138 = arith.constant 0 : index
    %295 = vector.load %arg8[%c0_137, %c0_138] : memref<2x1xf32, #tpu.memory_space<vmem>>, vector<2x1xf32>
    tpu.vector_store %arg8[%c0_137, %c0_138], %294 {strides = array<i32>} : memref<2x1xf32, #tpu.memory_space<vmem>>, vector<2x1xf32>,
    return
  }
}

</mosaic_0001>

<bundles_post_ra>
// kernel: pretrained_model_forward.1
= control target key start
LH: loop header
LB: loop body
LE: loop exit
PB: predicated region body
PF: predicated region fallthrough
CT: control target
= control target key end

     0   :  { %vm36_vm0 = vcmask 261120   ;;  %v1798_v14 = vmov 0.0   ;;  %vm1799_vm1 = vmmov 0   ;;  %s1800_s18 = smov 80   ;;  %s1801_s19 = smov 96   ;;  %vm153_vm2 = vcmask 130048   ;;  %s2176_s0 = inlined_call_operand.vmem [shape: f32[16,32], index: 0, kind: input, shape index: {}]   ;;  %s2177_s3 = inlined_call_operand.vmem [shape: bf16[2,32,96], index: 3, kind: input, shape index: {}]   ;;  %s2178_s2 = inlined_call_operand.vmem [shape: f32[5,32], index: 2, kind: input, shape index: {}]   ;;  %s2179_s7 = inlined_call_operand.vmem [shape: f32[2,8,96], index: 7, kind: input, shape index: {}]   ;;  %s2180_s1 = inlined_call_operand.vmem [shape: f32[16,16], index: 1, kind: input, shape index: {}]   ;;  %s2181_s4 = inlined_call_operand.vmem [shape: bf16[3,32,32], index: 4, kind: input, shape index: {}]   ;;  %s2182_s5 = inlined_call_operand.vmem [shape: bf16[2,32,64], index: 5, kind: input, shape index: {}]   ;;  %s2183_s6 = inlined_call_operand.vmem [shape: bf16[2,64,32], index: 6, kind: input, shape index: {}]   ;;  %s2184_s8 = inlined_call_operand.vmem [shape: f32[2,1], index: 8, kind: output, shape index: {}]  }
   0x1   :  { %v34_v0 = vld [vmem:[%s2176_s0] sm:$0xff]  ;;  %v35_v1 = vld [vmem:[%s2176_s0 + $0x8] sm:$0xff]  ;;  %1568 = vmatprep.subr.bf16.mxu0 %v1798_v14  ;;  %1572 = vmatprep.mubr.msk.bf16.mxu0 %vm1799_vm1, %v1798_v14  ;;  %s1802_s20 = smov 112   ;;  %s1804_s25 = smov 48   ;;  %vm619_vm3 = vcmask 523264   ;;  %vm1346_vm4 = vcmask 1040384  }
   0x2   :  { %v37_v2 = vsel %vm36_vm0, %v34_v0, 0.0  ;;  %v40_v3 = vsel %vm36_vm0, %v35_v1, 0.0  ;;  %v1714_v15 = vld [vmem:[%s2177_s3 + $0x8] sm:$0xff]   ;;  %1576 = vmatprep.subr.bf16.mxu1 %v1798_v14  ;;  %1578 = vmatprep.mubr.msk.bf16.mxu1 %vm1799_vm1, %v1798_v14  ;;  %v1715_v16 = vld [vmem:[%s2177_s3] sm:$0xff]   ;;  %s1805_s30 = smov 16   ;;  %vm1414_vm5 = vcmask 254976  }
   0x3   :  { %38 = vadd.xlane.f32.xlu0 %v37_v2  ;;  %1569 = vmatpush3.bf16.msra.mxu0 %v1714_v15  ;;  %v1429_v25 = vld [vmem:[%s2178_s2] ss:$0 sm:$0xff]  ;;  %v1430_v29 = vld [vmem:[%s2178_s2 + $0x1] ss:$0 sm:$0xff]  ;;  %v1921_v51 = vld [vmem:[%s2180_s1 + $0x8] sm:$0xff]  ;;  %vm1423_vm6 = vcmask 1024  }
   0x4   :  { %1570 = vmatprep.subr.bf16.mxu0 %v1798_v14  ;;  %v1431_v35 = vld [vmem:[%s2179_s7] ss:$0 sm:$0xff] }
   0x5   :  { %v1915_v47 = vld [vmem:[%s2180_s1] sm:$0xff]  ;;  %s1803_s1 = smov 64  }
   0x7   :  { %41 = vadd.xlane.f32.xlu0 %v40_v3  ;;  %1571 = vmatpush3.bf16.msra.mxu0 %v1715_v16 }
   0x8   :  { %1582 = vmatprep.subr.bf16.mxu0 %v1798_v14 }
  0x8c   :  { %v39_v4 = vpop.xlane.xlu0 %38 }
  0x8d   :  { %v44_v5 = vmul.f32 0.03125, %v39_v4 }
  0x8f   :  { %v46_v6 = vsub.f32 %v34_v0, %v44_v5 }
  0x90   :  { %v42_v7 = vpop.xlane.xlu0 %41 }
  0x91   :  { %v45_v8 = vmul.f32 0.03125, %v42_v7  ;;  %v48_v9 = vmul.f32 %v46_v6, %v46_v6 }
  0x93   :  { %v47_v10 = vsub.f32 %v35_v1, %v45_v8  ;;  %v50_v11 = vsel %vm36_vm0, %v48_v9, 0.0 }
  0x94   :  { %51 = vadd.xlane.f32.xlu1 %v50_v11 }
  0x95   :  { %v49_v12 = vmul.f32 %v47_v10, %v47_v10 }
  0x97   :  { %v53_v13 = vsel %vm36_vm0, %v49_v12, 0.0 }
  0x98   :  { %54 = vadd.xlane.f32.xlu1 %v53_v13 }
 0x11d   :  { %v52_v17 = vpop.xlane.xlu1 %51 }
 0x11e   :  { %v56_v18 = vmul.f32 0.03125, %v52_v17 }
 0x120   :  { %v58_v19 = vadd.f32 1e-12, %v56_v18 }
 0x121   :  { %v55_v20 = vpop.xlane.xlu1 %54 }
 0x122   :  { %1736 = vrsqrt.f32 %v58_v19  ;;  %v57_v21 = vmul.f32 0.03125, %v55_v20 }
 0x124   :  { %v59_v22 = vadd.f32 1e-12, %v57_v21 }
 0x126   :  { %1738 = vrsqrt.f32 %v59_v22 }
 0x12f   :  { %v1737_v23 = vpop.eup %1736 }
 0x130   :  { %v62_v24 = vmul.f32 %v1737_v23, %v46_v6 }
 0x132   :  { %v68_v28 = vmul.f32 %v1429_v25, %v62_v24 }
 0x133   :  { %v1739_v26 = vpop.eup %1738 }
 0x134   :  { %v63_v27 = vmul.f32 %v1739_v26, %v47_v10  ;;  %v1881_v31 = vadd.f32 %v1430_v29, %v68_v28 }
 0x136   :  { %v69_v30 = vmul.f32 %v1429_v25, %v63_v27 }
 0x138   :  { %v1883_v32 = vadd.f32 %v1430_v29, %v69_v30 }
 0x13a   :  { %v84_v33 = vpack.c.bf16 %v1883_v32, %v1881_v31 }
 0x13c   :  { %1573 = vmatmul.mubr.msk.bf16.vlgmr.msra.gmra.mxu0 %vm36_vm0, %v84_v33 }
 0x13d   :  { %1584 = vmatprep.mubr.msk.bf16.mxu0 %vm1799_vm1, %v1798_v14 }
 0x1fc   :  { %v142_v34 = vpop.f32.mrf.mxu0 }
 0x1fd   :  { %v143_v38 = vadd.f32 %v1431_v35, %v142_v34 }
 0x1fe   :  { %v1574_v36 = vpop.f32.mrf.mxu0 }
 0x200   :  { %v145_v37 = vpop.f32.mrf.mxu0 }
 0x201   :  { %v146_v39 = vadd.f32 %v1431_v35, %v145_v37 }
 0x202   :  { %v1575_v40 = vpop.f32.mrf.mxu0 }
 0x203   :  { %v1893_v41 = vpack.c.bf16 %v146_v39, %v143_v38  ;;  %v1716_v40 = vld [vmem:[%s2181_s4 + $0x8] sm:$0xff]  }
 0x205   :  { %273 = vrot.lane.b32.xlu1 %v1893_v41, %s1800_s18  ;;  %151 = vrot.lane.b32.xlu0 %v1893_v41, %s1801_s19 }
 0x209   :  { %271 = vrot.lane.b32.xlu1 %v1893_v41, %s1802_s20 }
 0x277   :  { %v152_v42 = vpop.permute.xlu0 %151  ;;  %v274_v44 = vpop.permute.xlu1 %273 }
 0x278   :  { %v158_v43 = vsel %vm153_vm2, %v152_v42, 0  ;;  %v279_v45 = vsel %vm153_vm2, %v274_v44, 0 }
 0x279   :  { %1577 = vmatpush3.bf16.xpose.msra.mxu1 %v158_v43  ;;  %v1717_v43 = vld [vmem:[%s2181_s4] sm:$0xff]  }
 0x27a   :  { %1588 = vmatprep.subr.bf16.mxu1 %v1798_v14 }
 0x27b   :  { %v272_v46 = vpop.permute.xlu1 %271 }
 0x280   :  { %1579 = vmatmul.mubr.msk.bf16.vlgmr.msra.gmra.mxu1 %vm153_vm2, %v1893_v41 }
 0x281   :  { %1589 = vmatpush3.bf16.xpose.msra.mxu1 %v279_v45  ;;  %1590 = vmatprep.mubr.msk.bf16.mxu1 %vm1799_vm1, %v1798_v14 }
 0x282   :  { %1600 = vmatprep.subr.bf16.mxu1 %v1798_v14 }
 0x288   :  { %1591 = vmatmul.mubr.msk.bf16.vlgmr.msra.gmra.mxu1 %vm153_vm2, %v272_v46 }
 0x289   :  { %1604 = vmatprep.mubr.msk.bf16.mxu1 %vm1799_vm1, %v1798_v14  ;;  %1601 = vmatpush3.bf16.msra.mxu1 %v1716_v40  ;;  %v1445_v40 = vld [vmem:[%s2179_s7 + $0x4] ss:$0 sm:$0xff] }
 0x28a   :  { %1602 = vmatprep.subr.bf16.mxu1 %v1798_v14 }
 0x28d   :  { %1603 = vmatpush3.bf16.msra.mxu1 %v1717_v43 }
 0x28e   :  { %1616 = vmatprep.subr.bf16.mxu1 %v1798_v14 }
 0x340   :  { %v194_v48 = vpop.f32.mrf.mxu1 }
 0x341   :  { %v195_v49 = vadd.f32 %v194_v48, %v1915_v47 }
 0x342   :  { %v1580_v50 = vpop.f32.mrf.mxu1 }
 0x343   :  { %v201_v52 = vsel %vm153_vm2, %v195_v49, -inf }
 0x344   :  { %202 = vmax.xlane.f32.xlu1 %v201_v52  ;;  %v197_v53 = vpop.f32.mrf.mxu1 }
 0x345   :  { %v198_v54 = vadd.f32 %v197_v53, %v1921_v51 }
 0x346   :  { %v1581_v55 = vpop.f32.mrf.mxu1 }
 0x347   :  { %v204_v56 = vsel %vm153_vm2, %v198_v54, -inf }
 0x348   :  { %205 = vmax.xlane.f32.xlu0 %v204_v56  ;;  %v315_v57 = vpop.f32.mrf.mxu1 }
 0x349   :  { %v316_v58 = vadd.f32 %v315_v57, %v1915_v47 }
 0x34a   :  { %v1592_v59 = vpop.f32.mrf.mxu1 }
 0x34b   :  { %v322_v60 = vsel %vm153_vm2, %v316_v58, -inf  ;;  %v1439_v59 = vld [vmem:[%s2179_s7 + $0x1] ss:$0 sm:$0xff] }
 0x34c   :  { %323 = vmax.xlane.f32.xlu0 %v322_v60  ;;  %v318_v61 = vpop.f32.mrf.mxu1 }
 0x34d   :  { %v319_v62 = vadd.f32 %v318_v61, %v1921_v51 }
 0x34e   :  { %v1593_v63 = vpop.f32.mrf.mxu1 }
 0x34f   :  { %v325_v0 = vsel %vm153_vm2, %v319_v62, -inf }
 0x350   :  { %326 = vmax.xlane.f32.xlu0 %v325_v0 }
 0x3cd   :  { %v203_v1 = vpop.xlane.xlu1 %202 }
 0x3ce   :  { %v207_v2 = vsub.f32 %v195_v49, %v203_v1 }
 0x3d0   :  { %v209_v3 = vmul.f32 1.442695, %v207_v2 }
 0x3d1   :  { %v206_v4 = vpop.xlane.xlu0 %205 }
 0x3d2   :  { %1740 = vpow2.f32 %v209_v3  ;;  %v208_v5 = vsub.f32 %v198_v54, %v206_v4 }
 0x3d4   :  { %v211_v6 = vmul.f32 1.442695, %v208_v5 }
 0x3d5   :  { %v324_v7 = vpop.xlane.xlu0 %323 }
 0x3d6   :  { %1742 = vpow2.f32 %v211_v6  ;;  %v328_v8 = vsub.f32 %v316_v58, %v324_v7 }
 0x3d8   :  { %v330_v9 = vmul.f32 1.442695, %v328_v8 }
 0x3d9   :  { %v327_v10 = vpop.xlane.xlu0 %326 }
 0x3da   :  { %1744 = vpow2.f32 %v330_v9  ;;  %v329_v11 = vsub.f32 %v319_v62, %v327_v10 }
 0x3dc   :  { %v332_v12 = vmul.f32 1.442695, %v329_v11 }
 0x3de   :  { %1746 = vpow2.f32 %v332_v12 }
 0x3df   :  { %v1741_v13 = vpop.eup %1740 }
 0x3e0   :  { %v213_v15 = vsel %vm153_vm2, %v1741_v13, 0.0 }
 0x3e1   :  { %214 = vadd.xlane.f32.xlu1 %v213_v15 }
 0x3e3   :  { %v1743_v16 = vpop.eup %1742 }
 0x3e4   :  { %v216_v17 = vsel %vm153_vm2, %v1743_v16, 0.0 }
 0x3e5   :  { %217 = vadd.xlane.f32.xlu0 %v216_v17 }
 0x3e7   :  { %v1745_v18 = vpop.eup %1744 }
 0x3e8   :  { %v334_v19 = vsel %vm153_vm2, %v1745_v18, 0.0 }
 0x3e9   :  { %335 = vadd.xlane.f32.xlu1 %v334_v19 }
 0x3eb   :  { %v1747_v20 = vpop.eup %1746 }
 0x3ec   :  { %v337_v21 = vsel %vm153_vm2, %v1747_v20, 0.0 }
 0x3ed   :  { %338 = vadd.xlane.f32.xlu0 %v337_v21 }
 0x3fa   :  { %224 = vrot.lane.b32.xlu1 %v1893_v41, %s1803_s1 }
 0x403   :  { %345 = vrot.lane.b32.xlu0 %v1893_v41, %s1804_s25 }
 0x46a   :  { %v215_v22 = vpop.xlane.xlu1 %214 }
 0x46b   :  { %1748 = vrcp.f32 %v215_v22 }
 0x46e   :  { %v218_v23 = vpop.xlane.xlu0 %217 }
 0x46f   :  { %1750 = vrcp.f32 %v218_v23 }
 0x472   :  { %v336_v24 = vpop.xlane.xlu1 %335 }
 0x473   :  { %1752 = vrcp.f32 %v336_v24 }
 0x476   :  { %v225_v25 = vpop.permute.xlu1 %224  ;;  %v339_v26 = vpop.xlane.xlu0 %338 }
 0x477   :  { %1754 = vrcp.f32 %v339_v26  ;;  %1583 = vmatpush3.bf16.msra.mxu0 %v225_v25  ;;  %v1443_v25 = vld [vmem:[%s2179_s7 + $0x2] ss:$0 sm:$0xff] }
 0x478   :  { %1594 = vmatprep.subr.bf16.mxu0 %v1798_v14  ;;  %v1749_v27 = vpop.eup %1748 }
 0x479   :  { %v221_v29 = vmul.f32 %v1749_v27, %v1741_v13 }
 0x47a   :  { %v346_v34 = vpop.permute.xlu0 %345 }
 0x47c   :  { %v1751_v28 = vpop.eup %1750 }
 0x47d   :  { %v222_v30 = vmul.f32 %v1751_v28, %v1743_v16  ;;  %v1719_v16 = vld [vmem:[%s2182_s5] sm:$0xff]  }
 0x47f   :  { %v223_v33 = vpack.c.bf16 %v222_v30, %v221_v29  ;;  %v1444_v29 = vld [vmem:[%s2179_s7 + $0x3] ss:$0 sm:$0xff] }
 0x480   :  { %v1753_v35 = vpop.eup %1752 }
 0x481   :  { %1585 = vmatmul.mubr.msk.bf16.vlgmr.msra.gmra.mxu0 %vm153_vm2, %v223_v33  ;;  %v342_v37 = vmul.f32 %v1753_v35, %v1745_v18 }
 0x482   :  { %1595 = vmatpush3.bf16.msra.mxu0 %v346_v34  ;;  %1596 = vmatprep.mubr.msk.bf16.mxu0 %vm1799_vm1, %v1798_v14 }
 0x483   :  { %1608 = vmatprep.subr.bf16.mxu0 %v1798_v14 }
 0x484   :  { %v1755_v36 = vpop.eup %1754 }
 0x485   :  { %v343_v38 = vmul.f32 %v1755_v36, %v1747_v20  ;;  %v1720_v36 = vld [vmem:[%s2183_s6 + $0x18] sm:$0xff]  }
 0x487   :  { %v344_v39 = vpack.c.bf16 %v343_v38, %v342_v37  ;;  %v1721_v37 = vld [vmem:[%s2183_s6 + $0x10] sm:$0xff]   ;;  %v1722_v38 = vld [vmem:[%s2183_s6 + $0x8] sm:$0xff]  }
 0x489   :  { %1597 = vmatmul.mubr.msk.bf16.vlgmr.msra.gmra.mxu0 %vm153_vm2, %v344_v39  ;;  %v1723_v39 = vld [vmem:[%s2183_s6] sm:$0xff]  }
 0x48a   :  { %1612 = vmatprep.mubr.msk.bf16.mxu0 %vm1799_vm1, %v1798_v14 }
 0x541   :  { %v264_v41 = vpop.f32.mrf.mxu0 }
 0x543   :  { %v1586_v42 = vpop.f32.mrf.mxu0 }
 0x545   :  { %v267_v44 = vpop.f32.mrf.mxu0 }
 0x547   :  { %v1587_v45 = vpop.f32.mrf.mxu0 }
 0x549   :  { %v385_v46 = vpop.f32.mrf.mxu0 }
 0x54b   :  { %v1598_v48 = vpop.f32.mrf.mxu0 }
 0x54d   :  { %v388_v49 = vpop.f32.mrf.mxu0 }
 0x54e   :  { %v1704_v50 = vpack.i.bf16 %v388_v49, %v385_v46 }
 0x54f   :  { %v1599_v52 = vpop.f32.mrf.mxu0 }
 0x550   :  { %1705 = vrot.lane.b32.xlu1 %v1704_v50, %s1805_s30 }
 0x5c2   :  { %v1706_v53 = vpop.permute.xlu1 %1705 }
 0x5c3   :  { %v1708_v54 = vunpack.i.h.bf16 %v1706_v53  ;;  %v1707_v55 = vunpack.i.l.bf16 %v1706_v53 }
 0x5c5   :  { %v401_v56 = vsel %vm153_vm2, %v267_v44, %v1708_v54  ;;  %v400_v57 = vsel %vm153_vm2, %v264_v41, %v1707_v55 }
 0x5c6   :  { %v402_v58 = vpack.c.bf16 %v401_v56, %v400_v57 }
 0x5c8   :  { %1605 = vmatmul.mubr.msk.bf16.vlgmr.msra.gmra.mxu1 %vm36_vm0, %v402_v58 }
 0x5c9   :  { %1624 = vmatprep.mubr.msk.bf16.mxu1 %vm1799_vm1, %v1798_v14  ;;  %1617 = vmatpush3.bf16.msra.mxu1 %v1720_v36 }
 0x5ca   :  { %1618 = vmatprep.subr.bf16.mxu1 %v1798_v14 }
 0x5cd   :  { %1619 = vmatpush3.bf16.msra.mxu1 %v1721_v37 }
 0x5ce   :  { %1620 = vmatprep.subr.bf16.mxu1 %v1798_v14 }
 0x5d1   :  { %1621 = vmatpush3.bf16.msra.mxu1 %v1722_v38  ;;  %v1469_v38 = vld [vmem:[%s2179_s7 + $0x8] ss:$0 sm:$0xff] }
 0x5d2   :  { %1622 = vmatprep.subr.bf16.mxu1 %v1798_v14 }
 0x5d5   :  { %1623 = vmatpush3.bf16.msra.mxu1 %v1723_v39 }
 0x5d6   :  { %1642 = vmatprep.subr.bf16.mxu1 %v1798_v14 }
 0x688   :  { %v460_v60 = vpop.f32.mrf.mxu1 }
 0x689   :  { %v461_v61 = vadd.f32 %v1439_v59, %v460_v60  ;;  %v1449_v60 = vld [vmem:[%s2179_s7 + $0x5] ss:$0 sm:$0xff] }
 0x68a   :  { %v1606_v62 = vpop.f32.mrf.mxu1 }
 0x68b   :  { %v467_v63 = vadd.f32 %v461_v61, %v1881_v31 }
 0x68c   :  { %v463_v0 = vpop.f32.mrf.mxu1 }
 0x68d   :  { %v464_v1 = vadd.f32 %v1439_v59, %v463_v0  ;;  %v469_v2 = vsel %vm36_vm0, %v467_v63, 0.0 }
 0x68e   :  { %470 = vadd.xlane.f32.xlu1 %v469_v2  ;;  %v1607_v3 = vpop.f32.mrf.mxu1 }
 0x68f   :  { %v468_v4 = vadd.f32 %v464_v1, %v1883_v32  ;;  %v1718_v32 = vld [vmem:[%s2182_s5 + $0x8] sm:$0xff]  }
 0x690   :  { %1609 = vmatpush3.bf16.msra.mxu0 %v1718_v32 }
 0x691   :  { %v472_v5 = vsel %vm36_vm0, %v468_v4, 0.0  ;;  %1610 = vmatprep.subr.bf16.mxu0 %v1798_v14 }
 0x692   :  { %473 = vadd.xlane.f32.xlu0 %v472_v5 }
 0x694   :  { %1611 = vmatpush3.bf16.msra.mxu0 %v1719_v16  ;;  %v1724_v16 = vld [vmem:[%s2177_s3 + $0x18] sm:$0xff]  }
 0x695   :  { %1628 = vmatprep.subr.bf16.mxu0 %v1798_v14 }
 0x717   :  { %v471_v6 = vpop.xlane.xlu1 %470 }
 0x718   :  { %v475_v7 = vmul.f32 0.03125, %v471_v6 }
 0x71a   :  { %v477_v8 = vsub.f32 %v467_v63, %v475_v7 }
 0x71b   :  { %v474_v9 = vpop.xlane.xlu0 %473 }
 0x71c   :  { %v476_v10 = vmul.f32 0.03125, %v474_v9  ;;  %v479_v11 = vmul.f32 %v477_v8, %v477_v8 }
 0x71e   :  { %v478_v12 = vsub.f32 %v468_v4, %v476_v10  ;;  %v481_v31 = vsel %vm36_vm0, %v479_v11, 0.0 }
 0x71f   :  { %482 = vadd.xlane.f32.xlu0 %v481_v31 }
 0x720   :  { %v480_v13 = vmul.f32 %v478_v12, %v478_v12 }
 0x722   :  { %v484_v15 = vsel %vm36_vm0, %v480_v13, 0.0 }
 0x723   :  { %485 = vadd.xlane.f32.xlu1 %v484_v15 }
 0x7a8   :  { %v483_v17 = vpop.xlane.xlu0 %482 }
 0x7a9   :  { %v487_v18 = vmul.f32 0.03125, %v483_v17  ;;  %v1725_v17 = vld [vmem:[%s2177_s3 + $0x10] sm:$0xff]  }
 0x7ab   :  { %v489_v19 = vadd.f32 1e-12, %v487_v18 }
 0x7ac   :  { %v486_v20 = vpop.xlane.xlu1 %485 }
 0x7ad   :  { %1756 = vrsqrt.f32 %v489_v19  ;;  %v488_v21 = vmul.f32 0.03125, %v486_v20 }
 0x7af   :  { %v490_v22 = vadd.f32 1e-12, %v488_v21 }
 0x7b1   :  { %1758 = vrsqrt.f32 %v490_v22 }
 0x7ba   :  { %v1757_v23 = vpop.eup %1756 }
 0x7bb   :  { %v493_v24 = vmul.f32 %v1757_v23, %v477_v8 }
 0x7bd   :  { %v499_v28 = vmul.f32 %v1443_v25, %v493_v24 }
 0x7be   :  { %v1759_v26 = vpop.eup %1758 }
 0x7bf   :  { %v494_v27 = vmul.f32 %v1759_v26, %v478_v12  ;;  %v505_v33 = vadd.f32 %v1444_v29, %v499_v28  ;;  %v1455_v26 = vld [vmem:[%s2179_s7 + $0x6] ss:$0 sm:$0xff] }
 0x7c1   :  { %v500_v30 = vmul.f32 %v1443_v25, %v494_v27 }
 0x7c3   :  { %v506_v34 = vadd.f32 %v1444_v29, %v500_v30  ;;  %v1456_v30 = vld [vmem:[%s2179_s7 + $0x7] ss:$0 sm:$0xff] }
 0x7c5   :  { %v507_v35 = vpack.c.bf16 %v506_v34, %v505_v33 }
 0x7c7   :  { %1613 = vmatmul.mubr.msk.bf16.vlgmr.msra.gmra.mxu0 %vm36_vm0, %v507_v35 }
 0x7c8   :  { %1632 = vmatprep.mubr.msk.bf16.mxu0 %vm1799_vm1, %v1798_v14  ;;  %1629 = vmatpush3.bf16.msra.mxu0 %v1724_v16 }
 0x7c9   :  { %1630 = vmatprep.subr.bf16.mxu0 %v1798_v14 }
 0x7cc   :  { %1631 = vmatpush3.bf16.msra.mxu0 %v1725_v17 }
 0x7cd   :  { %1636 = vmatprep.subr.bf16.mxu0 %v1798_v14 }
 0x887   :  { %v565_v41 = vpop.f32.mrf.mxu0 }
 0x888   :  { %v566_v42 = vadd.f32 %v1445_v40, %v565_v41 }
 0x889   :  { %v1614_v43 = vpop.f32.mrf.mxu0 }
 0x88a   :  { %v574_v44 = vmul.f32 0.70710677, %v566_v42  ;;  %v572_v54 = vmul.f32 0.5, %v566_v42 }
 0x88b   :  { %v568_v45 = vpop.f32.mrf.mxu0 }
 0x88c   :  { %1760 = verf.f32 %v574_v44  ;;  %v569_v46 = vadd.f32 %v1445_v40, %v568_v45 }
 0x88d   :  { %v1615_v48 = vpop.f32.mrf.mxu0 }
 0x88e   :  { %v575_v49 = vmul.f32 0.70710677, %v569_v46  ;;  %v573_v55 = vmul.f32 0.5, %v569_v46 }
 0x890   :  { %1762 = verf.f32 %v575_v49 }
 0x899   :  { %v1761_v50 = vpop.eup %1760 }
 0x89a   :  { %v578_v52 = vadd.f32 1.0, %v1761_v50 }
 0x89c   :  { %v580_v57 = vmul.f32 %v578_v52, %v572_v54 }
 0x89d   :  { %v1763_v53 = vpop.eup %1762 }
 0x89e   :  { %v579_v56 = vadd.f32 1.0, %v1763_v53 }
 0x8a0   :  { %v581_v58 = vmul.f32 %v579_v56, %v573_v55 }
 0x8a2   :  { %v582_v59 = vpack.c.bf16 %v581_v58, %v580_v57 }
 0x8a4   :  { %1625 = vmatmul.mubr.msk.bf16.vlgmr.msra.gmra.mxu1 %vm619_vm3, %v582_v59 }
 0x8a5   :  { %1644 = vmatprep.mubr.msk.bf16.mxu1 %vm1799_vm1, %v1798_v14 }
 0x964   :  { %v657_v61 = vpop.f32.mrf.mxu1 }
 0x965   :  { %v658_v62 = vadd.f32 %v1449_v60, %v657_v61 }
 0x966   :  { %v1626_v63 = vpop.f32.mrf.mxu1 }
 0x967   :  { %v664_v0 = vadd.f32 %v658_v62, %v505_v33 }
 0x968   :  { %v660_v1 = vpop.f32.mrf.mxu1 }
 0x969   :  { %v661_v2 = vadd.f32 %v1449_v60, %v660_v1  ;;  %v666_v3 = vsel %vm36_vm0, %v664_v0, 0.0 }
 0x96a   :  { %667 = vadd.xlane.f32.xlu0 %v666_v3  ;;  %v1627_v4 = vpop.f32.mrf.mxu1 }
 0x96b   :  { %v665_v5 = vadd.f32 %v661_v2, %v506_v34 }
 0x96d   :  { %v669_v6 = vsel %vm36_vm0, %v665_v5, 0.0 }
 0x96e   :  { %670 = vadd.xlane.f32.xlu1 %v669_v6 }
 0x9f3   :  { %v668_v7 = vpop.xlane.xlu0 %667 }
 0x9f4   :  { %v672_v8 = vmul.f32 0.03125, %v668_v7 }
 0x9f6   :  { %v674_v9 = vsub.f32 %v664_v0, %v672_v8 }
 0x9f7   :  { %v671_v10 = vpop.xlane.xlu1 %670 }
 0x9f8   :  { %v673_v11 = vmul.f32 0.03125, %v671_v10  ;;  %v676_v12 = vmul.f32 %v674_v9, %v674_v9 }
 0x9fa   :  { %v675_v31 = vsub.f32 %v665_v5, %v673_v11  ;;  %v678_v13 = vsel %vm36_vm0, %v676_v12, 0.0 }
 0x9fb   :  { %679 = vadd.xlane.f32.xlu0 %v678_v13 }
 0x9fc   :  { %v677_v15 = vmul.f32 %v675_v31, %v675_v31 }
 0x9fe   :  { %v681_v32 = vsel %vm36_vm0, %v677_v15, 0.0 }
 0x9ff   :  { %682 = vadd.xlane.f32.xlu1 %v681_v32 }
 0xa84   :  { %v680_v18 = vpop.xlane.xlu0 %679 }
 0xa85   :  { %v684_v19 = vmul.f32 0.03125, %v680_v18 }
 0xa87   :  { %v686_v20 = vadd.f32 1e-12, %v684_v19 }
 0xa88   :  { %v683_v21 = vpop.xlane.xlu1 %682 }
 0xa89   :  { %1764 = vrsqrt.f32 %v686_v20  ;;  %v685_v22 = vmul.f32 0.03125, %v683_v21 }
 0xa8b   :  { %v687_v23 = vadd.f32 1e-12, %v685_v22 }
 0xa8d   :  { %1766 = vrsqrt.f32 %v687_v23 }
 0xa96   :  { %v1765_v24 = vpop.eup %1764 }
 0xa97   :  { %v690_v25 = vmul.f32 %v1765_v24, %v674_v9 }
 0xa99   :  { %v696_v29 = vmul.f32 %v1455_v26, %v690_v25 }
 0xa9a   :  { %v1767_v27 = vpop.eup %1766 }
 0xa9b   :  { %v691_v28 = vmul.f32 %v1767_v27, %v675_v31  ;;  %v2029_v34 = vadd.f32 %v1456_v30, %v696_v29 }
 0xa9d   :  { %v697_v33 = vmul.f32 %v1455_v26, %v691_v28 }
 0xa9f   :  { %v2031_v35 = vadd.f32 %v1456_v30, %v697_v33 }
 0xaa1   :  { %v713_v36 = vpack.c.bf16 %v2031_v35, %v2029_v34 }
 0xaa3   :  { %1633 = vmatmul.mubr.msk.bf16.vlgmr.msra.gmra.mxu0 %vm36_vm0, %v713_v36 }
 0xaa4   :  { %1638 = vmatprep.mubr.msk.bf16.mxu0 %vm1799_vm1, %v1798_v14 }
 0xb63   :  { %v772_v37 = vpop.f32.mrf.mxu0 }
 0xb64   :  { %v773_v41 = vadd.f32 %v1469_v38, %v772_v37 }
 0xb65   :  { %v1634_v39 = vpop.f32.mrf.mxu0 }
 0xb67   :  { %v775_v40 = vpop.f32.mrf.mxu0 }
 0xb68   :  { %v776_v42 = vadd.f32 %v1469_v38, %v775_v40 }
 0xb69   :  { %v1635_v43 = vpop.f32.mrf.mxu0 }
 0xb6a   :  { %v2041_v44 = vpack.c.bf16 %v776_v42, %v773_v41  ;;  %v1726_v41 = vld [vmem:[%s2181_s4 + $0x18] sm:$0xff]  }
 0xb6c   :  { %902 = vrot.lane.b32.xlu1 %v2041_v44, %s1800_s18  ;;  %781 = vrot.lane.b32.xlu0 %v2041_v44, %s1801_s19 }
 0xb70   :  { %900 = vrot.lane.b32.xlu1 %v2041_v44, %s1802_s20 }
 0xbde   :  { %v782_v45 = vpop.permute.xlu0 %781  ;;  %v903_v48 = vpop.permute.xlu1 %902 }
 0xbdf   :  { %v787_v46 = vsel %vm153_vm2, %v782_v45, 0  ;;  %v908_v49 = vsel %vm153_vm2, %v903_v48, 0 }
 0xbe0   :  { %1637 = vmatpush3.bf16.xpose.msra.mxu0 %v787_v46 }
 0xbe1   :  { %1648 = vmatprep.subr.bf16.mxu0 %v1798_v14 }
 0xbe2   :  { %v901_v50 = vpop.permute.xlu1 %900 }
 0xbe7   :  { %1639 = vmatmul.mubr.msk.bf16.vlgmr.msra.gmra.mxu0 %vm153_vm2, %v2041_v44 }
 0xbe8   :  { %1649 = vmatpush3.bf16.xpose.msra.mxu0 %v908_v49  ;;  %1650 = vmatprep.mubr.msk.bf16.mxu0 %vm1799_vm1, %v1798_v14 }
 0xbe9   :  { %1660 = vmatprep.subr.bf16.mxu0 %v1798_v14 }
 0xbef   :  { %1651 = vmatmul.mubr.msk.bf16.vlgmr.msra.gmra.mxu0 %vm153_vm2, %v901_v50 }
 0xbf0   :  { %1664 = vmatprep.mubr.msk.bf16.mxu0 %vm1799_vm1, %v1798_v14  ;;  %1661 = vmatpush3.bf16.msra.mxu0 %v1726_v41 }
 0xbf1   :  { %1662 = vmatprep.subr.bf16.mxu0 %v1798_v14 }
 0xca7   :  { %v823_v52 = vpop.f32.mrf.mxu0 }
 0xca8   :  { %v824_v53 = vadd.f32 %v823_v52, %v1915_v47 }
 0xca9   :  { %v1640_v54 = vpop.f32.mrf.mxu0 }
 0xcaa   :  { %v830_v55 = vsel %vm153_vm2, %v824_v53, -inf }
 0xcab   :  { %831 = vmax.xlane.f32.xlu1 %v830_v55  ;;  %v826_v56 = vpop.f32.mrf.mxu0 }
 0xcac   :  { %v827_v57 = vadd.f32 %v826_v56, %v1921_v51 }
 0xcad   :  { %v1641_v58 = vpop.f32.mrf.mxu0 }
 0xcae   :  { %v833_v59 = vsel %vm153_vm2, %v827_v57, -inf }
 0xcaf   :  { %834 = vmax.xlane.f32.xlu0 %v833_v59  ;;  %v944_v60 = vpop.f32.mrf.mxu0 }
 0xcb0   :  { %v945_v61 = vadd.f32 %v944_v60, %v1915_v47  ;;  %v1481_v60 = vld [vmem:[%s2179_s7 + $0x9] ss:$0 sm:$0xff] }
 0xcb1   :  { %v1652_v62 = vpop.f32.mrf.mxu0 }
 0xcb2   :  { %v951_v63 = vsel %vm153_vm2, %v945_v61, -inf }
 0xcb3   :  { %952 = vmax.xlane.f32.xlu0 %v951_v63  ;;  %v947_v0 = vpop.f32.mrf.mxu0 }
 0xcb4   :  { %v948_v1 = vadd.f32 %v947_v0, %v1921_v51 }
 0xcb5   :  { %v1653_v2 = vpop.f32.mrf.mxu0 }
 0xcb6   :  { %v954_v3 = vsel %vm153_vm2, %v948_v1, -inf }
 0xcb7   :  { %955 = vmax.xlane.f32.xlu0 %v954_v3 }
 0xd34   :  { %v832_v4 = vpop.xlane.xlu1 %831 }
 0xd35   :  { %v836_v5 = vsub.f32 %v824_v53, %v832_v4 }
 0xd37   :  { %v838_v6 = vmul.f32 1.442695, %v836_v5 }
 0xd38   :  { %v835_v7 = vpop.xlane.xlu0 %834 }
 0xd39   :  { %1768 = vpow2.f32 %v838_v6  ;;  %v837_v8 = vsub.f32 %v827_v57, %v835_v7 }
 0xd3b   :  { %v840_v9 = vmul.f32 1.442695, %v837_v8 }
 0xd3c   :  { %v953_v10 = vpop.xlane.xlu0 %952 }
 0xd3d   :  { %1770 = vpow2.f32 %v840_v9  ;;  %v957_v47 = vsub.f32 %v945_v61, %v953_v10 }
 0xd3f   :  { %v959_v11 = vmul.f32 1.442695, %v957_v47 }
 0xd40   :  { %v956_v12 = vpop.xlane.xlu0 %955 }
 0xd41   :  { %1772 = vpow2.f32 %v959_v11  ;;  %v958_v31 = vsub.f32 %v948_v1, %v956_v12 }
 0xd43   :  { %v961_v13 = vmul.f32 1.442695, %v958_v31 }
 0xd45   :  { %1774 = vpow2.f32 %v961_v13 }
 0xd46   :  { %v1769_v51 = vpop.eup %1768 }
 0xd47   :  { %v842_v15 = vsel %vm153_vm2, %v1769_v51, 0.0 }
 0xd48   :  { %843 = vadd.xlane.f32.xlu1 %v842_v15 }
 0xd4a   :  { %v1771_v32 = vpop.eup %1770 }
 0xd4b   :  { %v845_v16 = vsel %vm153_vm2, %v1771_v32, 0.0 }
 0xd4c   :  { %846 = vadd.xlane.f32.xlu0 %v845_v16 }
 0xd4e   :  { %v1773_v17 = vpop.eup %1772 }
 0xd4f   :  { %v963_v18 = vsel %vm153_vm2, %v1773_v17, 0.0 }
 0xd50   :  { %964 = vadd.xlane.f32.xlu1 %v963_v18 }
 0xd52   :  { %v1775_v19 = vpop.eup %1774 }
 0xd53   :  { %v966_v20 = vsel %vm153_vm2, %v1775_v19, 0.0 }
 0xd54   :  { %967 = vadd.xlane.f32.xlu0 %v966_v20 }
 0xd61   :  { %853 = vrot.lane.b32.xlu1 %v2041_v44, %s1803_s1 }
 0xd6a   :  { %974 = vrot.lane.b32.xlu0 %v2041_v44, %s1804_s25  ;;  %v1727_v44 = vld [vmem:[%s2181_s4 + $0x10] sm:$0xff]  }
 0xd6b   :  { %1663 = vmatpush3.bf16.msra.mxu0 %v1727_v44 }
 0xd6c   :  { %1676 = vmatprep.subr.bf16.mxu0 %v1798_v14 }
 0xdd1   :  { %v844_v21 = vpop.xlane.xlu1 %843 }
 0xdd2   :  { %1776 = vrcp.f32 %v844_v21 }
 0xdd5   :  { %v847_v22 = vpop.xlane.xlu0 %846 }
 0xdd6   :  { %1778 = vrcp.f32 %v847_v22  ;;  %v1485_v22 = vld [vmem:[%s2179_s7 + $0xa] ss:$0 sm:$0xff] }
 0xdd9   :  { %v965_v23 = vpop.xlane.xlu1 %964 }
 0xdda   :  { %1780 = vrcp.f32 %v965_v23 }
 0xddd   :  { %v854_v24 = vpop.permute.xlu1 %853  ;;  %v968_v25 = vpop.xlane.xlu0 %967 }
 0xdde   :  { %1782 = vrcp.f32 %v968_v25  ;;  %1643 = vmatpush3.bf16.msra.mxu1 %v854_v24 }
 0xddf   :  { %1654 = vmatprep.subr.bf16.mxu1 %v1798_v14  ;;  %v1777_v26 = vpop.eup %1776 }
 0xde0   :  { %v850_v28 = vmul.f32 %v1777_v26, %v1769_v51  ;;  %v1729_v51 = vld [vmem:[%s2182_s5 + $0x10] sm:$0xff]   ;;  %v1486_v26 = vld [vmem:[%s2179_s7 + $0xb] ss:$0 sm:$0xff] }
 0xde1   :  { %v975_v33 = vpop.permute.xlu0 %974 }
 0xde3   :  { %v1779_v27 = vpop.eup %1778 }
 0xde4   :  { %v851_v29 = vmul.f32 %v1779_v27, %v1771_v32 }
 0xde6   :  { %v852_v30 = vpack.c.bf16 %v851_v29, %v850_v28 }
 0xde7   :  { %v1781_v36 = vpop.eup %1780 }
 0xde8   :  { %1645 = vmatmul.mubr.msk.bf16.vlgmr.msra.gmra.mxu1 %vm153_vm2, %v852_v30  ;;  %v971_v38 = vmul.f32 %v1781_v36, %v1773_v17  ;;  %v1731_v36 = vld [vmem:[%s2183_s6 + $0x30] sm:$0xff]  }
 0xde9   :  { %1655 = vmatpush3.bf16.msra.mxu1 %v975_v33  ;;  %1656 = vmatprep.mubr.msk.bf16.mxu1 %vm1799_vm1, %v1798_v14  ;;  %v1730_v33 = vld [vmem:[%s2183_s6 + $0x38] sm:$0xff]  }
 0xdea   :  { %1668 = vmatprep.subr.bf16.mxu1 %v1798_v14 }
 0xdeb   :  { %v1783_v37 = vpop.eup %1782 }
 0xdec   :  { %v972_v39 = vmul.f32 %v1783_v37, %v1775_v19  ;;  %v1732_v37 = vld [vmem:[%s2183_s6 + $0x28] sm:$0xff]  }
 0xdee   :  { %v973_v40 = vpack.c.bf16 %v972_v39, %v971_v38  ;;  %v1733_v38 = vld [vmem:[%s2183_s6 + $0x20] sm:$0xff]   ;;  %v1491_v39 = vld [vmem:[%s2179_s7 + $0xc] ss:$0 sm:$0xff] }
 0xdf0   :  { %1657 = vmatmul.mubr.msk.bf16.vlgmr.msra.gmra.mxu1 %vm153_vm2, %v973_v40 }
 0xdf1   :  { %1672 = vmatprep.mubr.msk.bf16.mxu1 %vm1799_vm1, %v1798_v14 }
 0xea8   :  { %v893_v42 = vpop.f32.mrf.mxu1 }
 0xeaa   :  { %v1646_v43 = vpop.f32.mrf.mxu1 }
 0xeac   :  { %v896_v45 = vpop.f32.mrf.mxu1 }
 0xeae   :  { %v1647_v46 = vpop.f32.mrf.mxu1 }
 0xeb0   :  { %v1014_v48 = vpop.f32.mrf.mxu1 }
 0xeb2   :  { %v1658_v49 = vpop.f32.mrf.mxu1 }
 0xeb4   :  { %v1017_v50 = vpop.f32.mrf.mxu1 }
 0xeb5   :  { %v1709_v52 = vpack.i.bf16 %v1017_v50, %v1014_v48 }
 0xeb6   :  { %v1659_v53 = vpop.f32.mrf.mxu1 }
 0xeb7   :  { %1710 = vrot.lane.b32.xlu1 %v1709_v52, %s1805_s30 }
 0xf29   :  { %v1711_v54 = vpop.permute.xlu1 %1710 }
 0xf2a   :  { %v1713_v55 = vunpack.i.h.bf16 %v1711_v54  ;;  %v1712_v56 = vunpack.i.l.bf16 %v1711_v54 }
 0xf2c   :  { %v1030_v57 = vsel %vm153_vm2, %v896_v45, %v1713_v55  ;;  %v1029_v58 = vsel %vm153_vm2, %v893_v42, %v1712_v56 }
 0xf2d   :  { %v1031_v59 = vpack.c.bf16 %v1030_v57, %v1029_v58 }
 0xf2f   :  { %1665 = vmatmul.mubr.msk.bf16.vlgmr.msra.gmra.mxu0 %vm36_vm0, %v1031_v59  ;;  %v1503_v59 = vld [vmem:[%s2179_s7 + $0xd] ss:$0 sm:$0xff] }
 0xf30   :  { %1684 = vmatprep.mubr.msk.bf16.mxu0 %vm1799_vm1, %v1798_v14  ;;  %1677 = vmatpush3.bf16.msra.mxu0 %v1730_v33  ;;  %v1515_v33 = vld [vmem:[%s2178_s2 + $0x2] ss:$0 sm:$0xff] }
 0xf31   :  { %1678 = vmatprep.subr.bf16.mxu0 %v1798_v14 }
 0xf34   :  { %1679 = vmatpush3.bf16.msra.mxu0 %v1731_v36 }
 0xf35   :  { %1680 = vmatprep.subr.bf16.mxu0 %v1798_v14 }
 0xf38   :  { %1681 = vmatpush3.bf16.msra.mxu0 %v1732_v37 }
 0xf39   :  { %1682 = vmatprep.subr.bf16.mxu0 %v1798_v14 }
 0xf3c   :  { %1683 = vmatpush3.bf16.msra.mxu0 %v1733_v38 }
 0xfef   :  { %v1090_v61 = vpop.f32.mrf.mxu0 }
 0xff0   :  { %v1091_v62 = vadd.f32 %v1481_v60, %v1090_v61 }
 0xff1   :  { %v1666_v63 = vpop.f32.mrf.mxu0 }
 0xff2   :  { %v1097_v0 = vadd.f32 %v1091_v62, %v2029_v34 }
 0xff3   :  { %v1093_v1 = vpop.f32.mrf.mxu0 }
 0xff4   :  { %v1094_v2 = vadd.f32 %v1481_v60, %v1093_v1  ;;  %v1099_v3 = vsel %vm36_vm0, %v1097_v0, 0.0 }
 0xff5   :  { %1100 = vadd.xlane.f32.xlu1 %v1099_v3  ;;  %v1667_v4 = vpop.f32.mrf.mxu0 }
 0xff6   :  { %v1098_v5 = vadd.f32 %v1094_v2, %v2031_v35  ;;  %v1728_v35 = vld [vmem:[%s2182_s5 + $0x18] sm:$0xff]  }
 0xff7   :  { %1669 = vmatpush3.bf16.msra.mxu1 %v1728_v35  ;;  %v1735_v35 = vld [vmem:[%s2181_s4 + $0x20] sm:$0xff]  }
 0xff8   :  { %v1102_v6 = vsel %vm36_vm0, %v1098_v5, 0.0  ;;  %1670 = vmatprep.subr.bf16.mxu1 %v1798_v14 }
 0xff9   :  { %1103 = vadd.xlane.f32.xlu0 %v1102_v6 }
 0xffb   :  { %1671 = vmatpush3.bf16.msra.mxu1 %v1729_v51 }
 0xffc   :  { %1688 = vmatprep.subr.bf16.mxu1 %v1798_v14 }
0x107e   :  { %v1101_v7 = vpop.xlane.xlu1 %1100 }
0x107f   :  { %v1105_v8 = vmul.f32 0.03125, %v1101_v7 }
0x1081   :  { %v1107_v9 = vsub.f32 %v1097_v0, %v1105_v8 }
0x1082   :  { %v1104_v10 = vpop.xlane.xlu0 %1103 }
0x1083   :  { %v1106_v47 = vmul.f32 0.03125, %v1104_v10  ;;  %v1109_v11 = vmul.f32 %v1107_v9, %v1107_v9 }
0x1085   :  { %v1108_v12 = vsub.f32 %v1098_v5, %v1106_v47  ;;  %v1111_v34 = vsel %vm36_vm0, %v1109_v11, 0.0 }
0x1086   :  { %1112 = vadd.xlane.f32.xlu0 %v1111_v34 }
0x1087   :  { %v1110_v31 = vmul.f32 %v1108_v12, %v1108_v12 }
0x1089   :  { %v1114_v13 = vsel %vm36_vm0, %v1110_v31, 0.0 }
0x108a   :  { %1115 = vadd.xlane.f32.xlu1 %v1114_v13  ;;  %v1734_v13 = vld [vmem:[%s2181_s4 + $0x28] sm:$0xff]  }
0x110f   :  { %v1113_v15 = vpop.xlane.xlu0 %1112 }
0x1110   :  { %v1117_v32 = vmul.f32 0.03125, %v1113_v15 }
0x1112   :  { %v1119_v16 = vadd.f32 1e-12, %v1117_v32 }
0x1113   :  { %v1116_v17 = vpop.xlane.xlu1 %1115 }
0x1114   :  { %1784 = vrsqrt.f32 %v1119_v16  ;;  %v1118_v18 = vmul.f32 0.03125, %v1116_v17 }
0x1116   :  { %v1120_v19 = vadd.f32 1e-12, %v1118_v18 }
0x1118   :  { %1786 = vrsqrt.f32 %v1120_v19 }
0x1121   :  { %v1785_v20 = vpop.eup %1784 }
0x1122   :  { %v1123_v21 = vmul.f32 %v1785_v20, %v1107_v9 }
0x1124   :  { %v1129_v25 = vmul.f32 %v1485_v22, %v1123_v21 }
0x1125   :  { %v1787_v23 = vpop.eup %1786 }
0x1126   :  { %v1124_v24 = vmul.f32 %v1787_v23, %v1108_v12  ;;  %v1135_v28 = vadd.f32 %v1486_v26, %v1129_v25 }
0x1128   :  { %v1130_v27 = vmul.f32 %v1485_v22, %v1124_v24  ;;  %v1509_v22 = vld [vmem:[%s2179_s7 + $0xe] ss:$0 sm:$0xff] }
0x112a   :  { %v1136_v29 = vadd.f32 %v1486_v26, %v1130_v27 }
0x112c   :  { %v1137_v30 = vpack.c.bf16 %v1136_v29, %v1135_v28 }
0x112e   :  { %1673 = vmatmul.mubr.msk.bf16.vlgmr.msra.gmra.mxu1 %vm36_vm0, %v1137_v30 }
0x112f   :  { %1692 = vmatprep.mubr.msk.bf16.mxu1 %vm1799_vm1, %v1798_v14  ;;  %1689 = vmatpush3.bf16.msra.mxu1 %v1734_v13 }
0x1130   :  { %1690 = vmatprep.subr.bf16.mxu1 %v1798_v14  ;;  %v1510_v14 = vld [vmem:[%s2179_s7 + $0xf] ss:$0 sm:$0xff] }
0x1133   :  { %1691 = vmatpush3.bf16.msra.mxu1 %v1735_v35 }
0x11ee   :  { %v1196_v40 = vpop.f32.mrf.mxu1 }
0x11ef   :  { %v1197_v41 = vadd.f32 %v1491_v39, %v1196_v40 }
0x11f0   :  { %v1674_v42 = vpop.f32.mrf.mxu1 }
0x11f1   :  { %v1205_v43 = vmul.f32 0.70710677, %v1197_v41  ;;  %v1203_v53 = vmul.f32 0.5, %v1197_v41  ;;  %v1519_v41 = vld [vmem:[%s2178_s2 + $0x3] ss:$0 sm:$0xff] }
0x11f2   :  { %v1199_v44 = vpop.f32.mrf.mxu1 }
0x11f3   :  { %1788 = verf.f32 %v1205_v43  ;;  %v1200_v45 = vadd.f32 %v1491_v39, %v1199_v44 }
0x11f4   :  { %v1675_v46 = vpop.f32.mrf.mxu1 }
0x11f5   :  { %v1206_v48 = vmul.f32 0.70710677, %v1200_v45  ;;  %v1204_v54 = vmul.f32 0.5, %v1200_v45  ;;  %v1520_v45 = vld [vmem:[%s2178_s2 + $0x4] ss:$0 sm:$0xff] }
0x11f7   :  { %1790 = verf.f32 %v1206_v48 }
0x1200   :  { %v1789_v49 = vpop.eup %1788 }
0x1201   :  { %v1209_v50 = vadd.f32 1.0, %v1789_v49 }
0x1203   :  { %v1211_v56 = vmul.f32 %v1209_v50, %v1203_v53 }
0x1204   :  { %v1791_v52 = vpop.eup %1790 }
0x1205   :  { %v1210_v55 = vadd.f32 1.0, %v1791_v52 }
0x1207   :  { %v1212_v57 = vmul.f32 %v1210_v55, %v1204_v54 }
0x1209   :  { %v1213_v58 = vpack.c.bf16 %v1212_v57, %v1211_v56 }
0x120b   :  { %1685 = vmatmul.mubr.msk.bf16.vlgmr.msra.gmra.mxu0 %vm619_vm3, %v1213_v58 }
0x12cb   :  { %v1288_v60 = vpop.f32.mrf.mxu0 }
0x12cc   :  { %v1289_v61 = vadd.f32 %v1503_v59, %v1288_v60 }
0x12cd   :  { %v1686_v62 = vpop.f32.mrf.mxu0 }
0x12ce   :  { %v1295_v63 = vadd.f32 %v1289_v61, %v1135_v28 }
0x12cf   :  { %v1291_v0 = vpop.f32.mrf.mxu0 }
0x12d0   :  { %v1292_v1 = vadd.f32 %v1503_v59, %v1291_v0  ;;  %v1297_v2 = vsel %vm36_vm0, %v1295_v63, 0.0 }
0x12d1   :  { %1298 = vadd.xlane.f32.xlu1 %v1297_v2  ;;  %v1687_v3 = vpop.f32.mrf.mxu0 }
0x12d2   :  { %v1296_v4 = vadd.f32 %v1292_v1, %v1136_v29 }
0x12d4   :  { %v1300_v5 = vsel %vm36_vm0, %v1296_v4, 0.0 }
0x12d5   :  { %1301 = vadd.xlane.f32.xlu0 %v1300_v5 }
0x135a   :  { %v1299_v6 = vpop.xlane.xlu1 %1298 }
0x135b   :  { %v1303_v7 = vmul.f32 0.03125, %v1299_v6 }
0x135d   :  { %v1305_v8 = vsub.f32 %v1295_v63, %v1303_v7 }
0x135e   :  { %v1302_v9 = vpop.xlane.xlu0 %1301 }
0x135f   :  { %v1304_v10 = vmul.f32 0.03125, %v1302_v9  ;;  %v1307_v47 = vmul.f32 %v1305_v8, %v1305_v8 }
0x1361   :  { %v1306_v11 = vsub.f32 %v1296_v4, %v1304_v10  ;;  %v1309_v12 = vsel %vm36_vm0, %v1307_v47, 0.0 }
0x1362   :  { %1310 = vadd.xlane.f32.xlu1 %v1309_v12 }
0x1363   :  { %v1308_v34 = vmul.f32 %v1306_v11, %v1306_v11 }
0x1365   :  { %v1312_v31 = vsel %vm36_vm0, %v1308_v34, 0.0 }
0x1366   :  { %1313 = vadd.xlane.f32.xlu0 %v1312_v31 }
0x13eb   :  { %v1311_v51 = vpop.xlane.xlu1 %1310 }
0x13ec   :  { %v1315_v15 = vmul.f32 0.03125, %v1311_v51 }
0x13ee   :  { %v1317_v32 = vadd.f32 1e-12, %v1315_v15 }
0x13ef   :  { %v1314_v16 = vpop.xlane.xlu0 %1313 }
0x13f0   :  { %1792 = vrsqrt.f32 %v1317_v32  ;;  %v1316_v17 = vmul.f32 0.03125, %v1314_v16 }
0x13f2   :  { %v1318_v18 = vadd.f32 1e-12, %v1316_v17 }
0x13f4   :  { %1794 = vrsqrt.f32 %v1318_v18 }
0x13fd   :  { %v1793_v19 = vpop.eup %1792 }
0x13fe   :  { %v1321_v20 = vmul.f32 %v1793_v19, %v1305_v8 }
0x1400   :  { %v1327_v24 = vmul.f32 %v1509_v22, %v1321_v20 }
0x1401   :  { %v1795_v21 = vpop.eup %1794 }
0x1402   :  { %v1322_v23 = vmul.f32 %v1795_v21, %v1306_v11  ;;  %v1333_v27 = vadd.f32 %v1510_v14, %v1327_v24 }
0x1404   :  { %v1328_v25 = vmul.f32 %v1509_v22, %v1322_v23 }
0x1406   :  { %v1334_v26 = vadd.f32 %v1510_v14, %v1328_v25 }
0x1408   :  { %v1344_v28 = vrot.slane %v1334_v26, 7 }
0x140a   :  { %v1347_v29 = vsel %vm1346_vm4, %v1333_v27, %v1344_v28 }
0x140b   :  { %v1348_v30 = vpack.c.bf16 %v1347_v29, %v1347_v29 }
0x140d   :  { %1693 = vmatmul.mubr.msk.bf16.vlgmr.msra.gmra.mxu1 %vm36_vm0, %v1348_v30 }
0x14cd   :  { %v1402_v36 = vpop.f32.mrf.mxu1 }
0x14ce   :  { %v1403_v37 = vadd.f32 %v1515_v33, %v1402_v36 }
0x14cf   :  { %v1694_v38 = vpop.f32.mrf.mxu1 }
0x14d0   :  { %1796 = vtanh.f32 %v1403_v37 }
0x14d1   :  { %v1405_v39 = vpop.f32.mrf.mxu1 }
0x14d3   :  { %v1695_v40 = vpop.f32.mrf.mxu1 }
0x14dd   :  { %v1797_v42 = vpop.eup %1796 }
0x14de   :  { %v1413_v43 = vmul.f32 %v1797_v42, %v1519_v41 }
0x14e0   :  { %v1415_v44 = vsel %vm1414_vm5, %v1413_v43, 0.0 }
0x14e1   :  { %1416 = vadd.xlane.f32.xlu0 %v1415_v44 }
0x156a   :  { %v1417_v46 = vpop.xlane.xlu0 %1416 }
0x156b   :  { %v1422_v48 = vadd.f32 %v1520_v45, %v1417_v46 }
0x156d   :  { %1424 = vst.msk [vmem:[%s2184_s8] sm:$0x3] %vm1423_vm6, %v1422_v48 }

</bundles_post_ra>
